<compile_context>
chip_gen: v7x
topology: tpu7x:2x2x1
jax: 0.10.0
libtpu: 0.0.40
codegen_flags: <defaults>
</compile_context>

<pallas_src>
import functools

import jax
import jax.numpy as jnp
from jax.experimental import pallas as pl
from jax.experimental.pallas import tpu as pltpu


# ---------------------------------------------------------------------------
# Kernel A: LayerNorm1 + multi-head self-attention + out projection + residual
# ---------------------------------------------------------------------------
def attn_kernel(x_ref, mask_ref, ln1w_ref, ln1b_ref,
                wq_ref, bq_ref, wk_ref, bk_ref, wv_ref, bv_ref,
                wo_ref, bo_ref, o_ref, *, num_heads, head_dim, scale, eps):
    x = x_ref[0]                                            # (S, D) f32 residual

    # --- LayerNorm1 (f32) ---
    mu = jnp.mean(x, axis=-1, keepdims=True)
    var = jnp.mean((x - mu) ** 2, axis=-1, keepdims=True)
    h = (x - mu) * jax.lax.rsqrt(var + eps)
    h = h * ln1w_ref[...] + ln1b_ref[...]
    hb = h.astype(jnp.bfloat16)                             # bf16 MXU operands

    # --- Q/K/V projections (bf16 x bf16 -> f32 accumulation) ---
    q = jnp.dot(hb, wq_ref[...], preferred_element_type=jnp.float32) + bq_ref[...]
    k = jnp.dot(hb, wk_ref[...], preferred_element_type=jnp.float32) + bk_ref[...]
    v = jnp.dot(hb, wv_ref[...], preferred_element_type=jnp.float32) + bv_ref[...]
    qb = q.astype(jnp.bfloat16)
    kb = k.astype(jnp.bfloat16)
    vb = v.astype(jnp.bfloat16)

    mask = mask_ref[0]                                      # (S, S) additive mask

    # --- per-head attention, out-projection fused per head (no concat) ---
    S = x.shape[0]
    D = x.shape[1]
    acc = jnp.zeros((S, D), jnp.float32)
    for hidx in range(num_heads):                           # static unrolled loop
        sl = slice(hidx * head_dim, (hidx + 1) * head_dim)
        qh, kh, vh = qb[:, sl], kb[:, sl], vb[:, sl]        # (S, hd) bf16
        # scores = qh @ kh.T  (contract over head_dim, no explicit transpose)
        s = jax.lax.dot_general(qh, kh, (((1,), (1,)), ((), ())),
                                preferred_element_type=jnp.float32) * scale
        s = s + mask
        s = s - jnp.max(s, axis=-1, keepdims=True)          # f32 softmax
        p = jnp.exp(s)
        p = p / jnp.sum(p, axis=-1, keepdims=True)
        oh = jnp.dot(p.astype(jnp.bfloat16), vh,
                     preferred_element_type=jnp.float32)     # (S, hd) f32
        # out_proj(concat_h(oh)) == sum_h oh @ Wo[h*hd:(h+1)*hd, :]
        acc = acc + jnp.dot(oh.astype(jnp.bfloat16), wo_ref[sl, :],
                            preferred_element_type=jnp.float32)

    out = acc + bo_ref[...]
    o_ref[0] = (x + out).astype(o_ref.dtype)                # residual add


# ---------------------------------------------------------------------------
# Kernel B: LayerNorm2 + MLP (fc1 -> tanh-GELU -> fc2) + residual, row-tiled
# ---------------------------------------------------------------------------
def mlp_kernel(y_ref, ln2w_ref, ln2b_ref, w1_ref, b1_ref, w2_ref, b2_ref,
               o_ref, *, eps):
    y = y_ref[...]                                          # (TM, D) f32 residual
    mu = jnp.mean(y, axis=-1, keepdims=True)
    var = jnp.mean((y - mu) ** 2, axis=-1, keepdims=True)
    h = (y - mu) * jax.lax.rsqrt(var + eps)
    h = h * ln2w_ref[...] + ln2b_ref[...]

    t = jnp.dot(h.astype(jnp.bfloat16), w1_ref[...],
                preferred_element_type=jnp.float32) + b1_ref[...]
    # gelu_pytorch_tanh: 0.5*x*(1+tanh(sqrt(2/pi)*(x+0.044715*x^3)))
    g = 0.5 * t * (1.0 + jnp.tanh(0.7978845608028654 * (t + 0.044715 * t * t * t)))
    out = jnp.dot(g.astype(jnp.bfloat16), w2_ref[...],
                  preferred_element_type=jnp.float32) + b2_ref[...]
    o_ref[...] = (y + out).astype(o_ref.dtype)


# ---------------------------------------------------------------------------
# Wrapper
# ---------------------------------------------------------------------------
def siglip_encoder_layer(x, attn_mask, params, *, num_heads, eps=1e-6, row_tile=16):
    B, S, D = x.shape
    head_dim = D // num_heads
    scale = head_dim ** -0.5
    inter = params["w1"].shape[1]

    def const2(b):                       # resident operands: constant block index
        return (0, 0)

    cparams = pltpu.CompilerParams(dimension_semantics=("parallel",),
                                   vmem_limit_bytes=32 * 1024 * 1024)

    # ---- attention half: grid over batch ----
    attn_out = pl.pallas_call(
        functools.partial(attn_kernel, num_heads=num_heads, head_dim=head_dim,
                          scale=scale, eps=eps),
        out_shape=jax.ShapeDtypeStruct((B, S, D), jnp.float32),
        grid=(B,),
        in_specs=[
            pl.BlockSpec((1, S, D), lambda b: (b, 0, 0)),   # hidden states
            pl.BlockSpec((1, S, S), lambda b: (b, 0, 0)),   # additive attn mask
            pl.BlockSpec((1, D), const2), pl.BlockSpec((1, D), const2),   # LN1
            pl.BlockSpec((D, D), const2), pl.BlockSpec((1, D), const2),   # Wq,bq
            pl.BlockSpec((D, D), const2), pl.BlockSpec((1, D), const2),   # Wk,bk
            pl.BlockSpec((D, D), const2), pl.BlockSpec((1, D), const2),   # Wv,bv
            pl.BlockSpec((D, D), const2), pl.BlockSpec((1, D), const2),   # Wo,bo
        ],
        out_specs=pl.BlockSpec((1, S, D), lambda b: (b, 0, 0)),
        compiler_params=cparams,
    )(x, attn_mask,
      params["ln1_g"], params["ln1_b"],
      params["wq"], params["bq"], params["wk"], params["bk"],
      params["wv"], params["bv"], params["wo"], params["bo"])

    # ---- MLP half: grid over row tiles of flattened (B*S, D) ----
    y = attn_out.reshape(B * S, D)
    n_rows = B * S
    assert n_rows % row_tile == 0 and row_tile % 8 == 0
    mlp_out = pl.pallas_call(
        functools.partial(mlp_kernel, eps=eps),
        out_shape=jax.ShapeDtypeStruct((n_rows, D), jnp.float32),
        grid=(n_rows // row_tile,),
        in_specs=[
            pl.BlockSpec((row_tile, D), lambda i: (i, 0)),   # activations (tiled)
            pl.BlockSpec((1, D), const2), pl.BlockSpec((1, D), const2),   # LN2
            pl.BlockSpec((D, inter), const2), pl.BlockSpec((1, inter), const2),
            pl.BlockSpec((inter, D), const2), pl.BlockSpec((1, D), const2),
        ],
        out_specs=pl.BlockSpec((row_tile, D), lambda i: (i, 0)),
        compiler_params=cparams,
    )(y, params["ln2_g"], params["ln2_b"],
      params["w1"], params["b1"], params["w2"], params["b2"])

    return mlp_out.reshape(B, S, D)


# ---------------------------------------------------------------------------
# Plain-JAX reference mirroring the same dtype path (bf16 matmuls, f32 acc)
# ---------------------------------------------------------------------------
def reference_layer(x, attn_mask, params, *, num_heads, eps=1e-6):
    B, S, D = x.shape
    hd = D // num_heads
    scale = hd ** -0.5

    def ln(z, g, b):
        mu = jnp.mean(z, axis=-1, keepdims=True)
        var = jnp.mean((z - mu) ** 2, axis=-1, keepdims=True)
        return (z - mu) * jax.lax.rsqrt(var + eps) * g + b

    def mm(a, w, b):
        return jnp.dot(a.astype(jnp.bfloat16), w,
                       preferred_element_type=jnp.float32) + b

    h = ln(x, params["ln1_g"], params["ln1_b"])
    q = mm(h, params["wq"], params["bq"]).reshape(B, S, num_heads, hd)
    k = mm(h, params["wk"], params["bk"]).reshape(B, S, num_heads, hd)
    v = mm(h, params["wv"], params["bv"]).reshape(B, S, num_heads, hd)
    q = jnp.transpose(q, (0, 2, 1, 3)).astype(jnp.bfloat16)
    k = jnp.transpose(k, (0, 2, 1, 3)).astype(jnp.bfloat16)
    v = jnp.transpose(v, (0, 2, 1, 3)).astype(jnp.bfloat16)
    s = jnp.einsum("bhqd,bhkd->bhqk", q, k,
                   preferred_element_type=jnp.float32) * scale
    s = s + attn_mask[:, None, :, :]
    p = jax.nn.softmax(s, axis=-1)
    o = jnp.einsum("bhqk,bhkd->bhqd", p.astype(jnp.bfloat16), v,
                   preferred_element_type=jnp.float32)
    o = jnp.transpose(o, (0, 2, 1, 3)).reshape(B, S, D)
    y = x + mm(o, params["wo"], params["bo"])

    h2 = ln(y, params["ln2_g"], params["ln2_b"])
    t = mm(h2, params["w1"], params["b1"])
    g = 0.5 * t * (1.0 + jnp.tanh(0.7978845608028654 * (t + 0.044715 * t * t * t)))
    return y + mm(g, params["w2"], params["b2"])


if __name__ == "__main__":
    # Small but lane-dense config: batch=2, seq=16, hidden=128 (4 heads x 32),
    # intermediate=256.
    B, S, D = 2, 16, 128
    H = 4
    INTER = 256
    EPS = 1e-6

    key = jax.random.PRNGKey(0)
    keys = jax.random.split(key, 16)
    x = jax.random.normal(keys[0], (B, S, D), jnp.float32)

    def linear_w(k, din, dout):
        # Weights generated directly in (in, out) layout; a real PyTorch
        # nn.Linear weight (out, in) would be transposed here.
        return (jax.random.normal(k, (din, dout), jnp.float32) * 0.05
                ).astype(jnp.bfloat16)

    params = {
        "ln1_g": 1.0 + 0.05 * jax.random.normal(keys[1], (1, D), jnp.float32),
        "ln1_b": 0.05 * jax.random.normal(keys[2], (1, D), jnp.float32),
        "wq": linear_w(keys[3], D, D),
        "bq": 0.05 * jax.random.normal(keys[4], (1, D), jnp.float32),
        "wk": linear_w(keys[5], D, D),
        "bk": 0.05 * jax.random.normal(keys[6], (1, D), jnp.float32),
        "wv": linear_w(keys[7], D, D),
        "bv": 0.05 * jax.random.normal(keys[8], (1, D), jnp.float32),
        "wo": linear_w(keys[9], D, D),
        "bo": 0.05 * jax.random.normal(keys[10], (1, D), jnp.float32),
        "ln2_g": 1.0 + 0.05 * jax.random.normal(keys[11], (1, D), jnp.float32),
        "ln2_b": 0.05 * jax.random.normal(keys[12], (1, D), jnp.float32),
        "w1": linear_w(keys[13], D, INTER),
        "b1": 0.05 * jax.random.normal(keys[14], (1, INTER), jnp.float32),
        "w2": linear_w(keys[15], INTER, D),
        "b2": jnp.zeros((1, D), jnp.float32),
    }

    # Module interface: additive mask of shape (B, 1, S, S) with very large
    # negative values on padded keys. Batch 1 masks out its last 4 keys.
    mask4d = jnp.zeros((B, 1, S, S), jnp.float32)
    mask4d = mask4d.at[1, :, :, S - 4:].set(-1e9)
    mask3d = mask4d[:, 0]                                   # (B, S, S) for kernel

    out = siglip_encoder_layer(x, mask3d, params, num_heads=H, eps=EPS,
                               row_tile=16)
    out = jax.block_until_ready(out)

    ref = reference_layer(x, mask3d, params, num_heads=H, eps=EPS)
    assert out.shape == (B, S, D)
    assert jnp.allclose(out, ref, atol=1e-2, rtol=1e-2), "mismatch vs reference"

    print("KERNEL_OK")
</pallas_src>

<mosaic_0001>
module attributes {stable_mosaic.version = 11 : i64} {
  func.func @attn_kernel(%arg0: i32, %arg1: memref<1x16x128xf32, #tpu.memory_space<vmem>>, %arg2: memref<1x16x16xf32, #tpu.memory_space<vmem>>, %arg3: memref<1x128xf32, #tpu.memory_space<vmem>>, %arg4: memref<1x128xf32, #tpu.memory_space<vmem>>, %arg5: memref<128x128xbf16, #tpu.memory_space<vmem>>, %arg6: memref<1x128xf32, #tpu.memory_space<vmem>>, %arg7: memref<128x128xbf16, #tpu.memory_space<vmem>>, %arg8: memref<1x128xf32, #tpu.memory_space<vmem>>, %arg9: memref<128x128xbf16, #tpu.memory_space<vmem>>, %arg10: memref<1x128xf32, #tpu.memory_space<vmem>>, %arg11: memref<128x128xbf16, #tpu.memory_space<vmem>>, %arg12: memref<1x128xf32, #tpu.memory_space<vmem>>, %arg13: memref<1x16x128xf32, #tpu.memory_space<vmem>>) attributes {dimension_semantics = [#tpu.dimension_semantics<parallel>], iteration_bounds = array<i64: 2>, scalar_prefetch = 0 : i64, scratch_operands = 0 : i64, tpu.core_type = #tpu.core_type<tc>, window_params = [{transform_indices = @transform_0, window_bounds = array<i64: 1, 16, 128>}, {transform_indices = @transform_1, window_bounds = array<i64: 1, 16, 16>}, {pipeline_mode = #tpu.pipeline_mode<synchronous>, transform_indices = @transform_2, window_bounds = array<i64: 1, 128>}, {pipeline_mode = #tpu.pipeline_mode<synchronous>, transform_indices = @transform_3, window_bounds = array<i64: 1, 128>}, {pipeline_mode = #tpu.pipeline_mode<synchronous>, transform_indices = @transform_4, window_bounds = array<i64: 128, 128>}, {pipeline_mode = #tpu.pipeline_mode<synchronous>, transform_indices = @transform_5, window_bounds = array<i64: 1, 128>}, {pipeline_mode = #tpu.pipeline_mode<synchronous>, transform_indices = @transform_6, window_bounds = array<i64: 128, 128>}, {pipeline_mode = #tpu.pipeline_mode<synchronous>, transform_indices = @transform_7, window_bounds = array<i64: 1, 128>}, {pipeline_mode = #tpu.pipeline_mode<synchronous>, transform_indices = @transform_8, window_bounds = array<i64: 128, 128>}, {pipeline_mode = #tpu.pipeline_mode<synchronous>, transform_indices = @transform_9, window_bounds = array<i64: 1, 128>}, {pipeline_mode = #tpu.pipeline_mode<synchronous>, transform_indices = @transform_10, window_bounds = array<i64: 128, 128>}, {pipeline_mode = #tpu.pipeline_mode<synchronous>, transform_indices = @transform_11, window_bounds = array<i64: 1, 128>}, {transform_indices = @transform_12, window_bounds = array<i64: 1, 16, 128>}]} {
    %c0 = arith.constant 0 : index
    %c0_0 = arith.constant 0 : index
    %c0_1 = arith.constant 0 : index
    %0 = vector.load %arg1[%c0, %c0_0, %c0_1] : memref<1x16x128xf32, #tpu.memory_space<vmem>>, vector<1x16x128xf32>
    %1 = vector.shape_cast %0 : vector<1x16x128xf32> to vector<16x128xf32>
    %cst = arith.constant dense<0.000000e+00> : vector<16xf32>
    %2 = vector.multi_reduction <add>, %1, %cst [1] : vector<16x128xf32> to vector<16xf32>
    %3 = vector.shape_cast %2 : vector<16xf32> to vector<16x1xf32>
    %cst_2 = arith.constant 1.280000e+02 : f32
    %4 = vector.broadcast %cst_2 : f32 to vector<16x1xf32>
    %5 = arith.divf %3, %4 : vector<16x1xf32>
    %6 = vector.broadcast %5 : vector<16x1xf32> to vector<16x128xf32>
    %7 = arith.subf %1, %6 : vector<16x128xf32>
    %8 = arith.mulf %7, %7 : vector<16x128xf32>
    %cst_3 = arith.constant dense<0.000000e+00> : vector<16xf32>
    %9 = vector.multi_reduction <add>, %8, %cst_3 [1] : vector<16x128xf32> to vector<16xf32>
    %10 = vector.shape_cast %9 : vector<16xf32> to vector<16x1xf32>
    %cst_4 = arith.constant 1.280000e+02 : f32
    %11 = vector.broadcast %cst_4 : f32 to vector<16x1xf32>
    %12 = arith.divf %10, %11 : vector<16x1xf32>
    %13 = vector.broadcast %5 : vector<16x1xf32> to vector<16x128xf32>
    %14 = arith.subf %1, %13 : vector<16x128xf32>
    %cst_5 = arith.constant 9.99999997E-7 : f32
    %15 = vector.broadcast %cst_5 : f32 to vector<16x1xf32>
    %16 = arith.addf %12, %15 : vector<16x1xf32>
    %17 = math.rsqrt %16 : vector<16x1xf32>
    %18 = vector.broadcast %17 : vector<16x1xf32> to vector<16x128xf32>
    %19 = arith.mulf %14, %18 : vector<16x128xf32>
    %c0_6 = arith.constant 0 : index
    %c0_7 = arith.constant 0 : index
    %20 = vector.load %arg3[%c0_6, %c0_7] : memref<1x128xf32, #tpu.memory_space<vmem>>, vector<1x128xf32>
    %21 = vector.broadcast %20 : vector<1x128xf32> to vector<16x128xf32>
    %22 = arith.mulf %19, %21 : vector<16x128xf32>
    %c0_8 = arith.constant 0 : index
    %c0_9 = arith.constant 0 : index
    %23 = vector.load %arg4[%c0_8, %c0_9] : memref<1x128xf32, #tpu.memory_space<vmem>>, vector<1x128xf32>
    %24 = vector.broadcast %23 : vector<1x128xf32> to vector<16x128xf32>
    %25 = arith.addf %22, %24 : vector<16x128xf32>
    %26 = arith.truncf %25 : vector<16x128xf32> to vector<16x128xbf16>
    %c0_10 = arith.constant 0 : index
    %c0_11 = arith.constant 0 : index
    %27 = vector.load %arg5[%c0_10, %c0_11] : memref<128x128xbf16, #tpu.memory_space<vmem>>, vector<128x128xbf16>
    %cst_12 = arith.constant dense<0.000000e+00> : vector<16x128xf32>
    %28 = tpu.matmul %26, %27, %cst_12 {dimension_numbers = #tpu.dot_dimension_numbers<[1], [0], [0], [1], [0, 0, 1, 1], [], []>} : vector<16x128xbf16>, vector<128x128xbf16>, vector<16x128xf32> -> vector<16x128xf32>
    %c0_13 = arith.constant 0 : index
    %c0_14 = arith.constant 0 : index
    %29 = vector.load %arg6[%c0_13, %c0_14] : memref<1x128xf32, #tpu.memory_space<vmem>>, vector<1x128xf32>
    %30 = vector.broadcast %29 : vector<1x128xf32> to vector<16x128xf32>
    %31 = arith.addf %28, %30 : vector<16x128xf32>
    %c0_15 = arith.constant 0 : index
    %c0_16 = arith.constant 0 : index
    %32 = vector.load %arg7[%c0_15, %c0_16] : memref<128x128xbf16, #tpu.memory_space<vmem>>, vector<128x128xbf16>
    %cst_17 = arith.constant dense<0.000000e+00> : vector<16x128xf32>
    %33 = tpu.matmul %26, %32, %cst_17 {dimension_numbers = #tpu.dot_dimension_numbers<[1], [0], [0], [1], [0, 0, 1, 1], [], []>} : vector<16x128xbf16>, vector<128x128xbf16>, vector<16x128xf32> -> vector<16x128xf32>
    %c0_18 = arith.constant 0 : index
    %c0_19 = arith.constant 0 : index
    %34 = vector.load %arg8[%c0_18, %c0_19] : memref<1x128xf32, #tpu.memory_space<vmem>>, vector<1x128xf32>
    %35 = vector.broadcast %34 : vector<1x128xf32> to vector<16x128xf32>
    %36 = arith.addf %33, %35 : vector<16x128xf32>
    %c0_20 = arith.constant 0 : index
    %c0_21 = arith.constant 0 : index
    %37 = vector.load %arg9[%c0_20, %c0_21] : memref<128x128xbf16, #tpu.memory_space<vmem>>, vector<128x128xbf16>
    %cst_22 = arith.constant dense<0.000000e+00> : vector<16x128xf32>
    %38 = tpu.matmul %26, %37, %cst_22 {dimension_numbers = #tpu.dot_dimension_numbers<[1], [0], [0], [1], [0, 0, 1, 1], [], []>} : vector<16x128xbf16>, vector<128x128xbf16>, vector<16x128xf32> -> vector<16x128xf32>
    %c0_23 = arith.constant 0 : index
    %c0_24 = arith.constant 0 : index
    %39 = vector.load %arg10[%c0_23, %c0_24] : memref<1x128xf32, #tpu.memory_space<vmem>>, vector<1x128xf32>
    %40 = vector.broadcast %39 : vector<1x128xf32> to vector<16x128xf32>
    %41 = arith.addf %38, %40 : vector<16x128xf32>
    %42 = arith.truncf %31 : vector<16x128xf32> to vector<16x128xbf16>
    %43 = arith.truncf %36 : vector<16x128xf32> to vector<16x128xbf16>
    %44 = arith.truncf %41 : vector<16x128xf32> to vector<16x128xbf16>
    %c0_25 = arith.constant 0 : index
    %c0_26 = arith.constant 0 : index
    %c0_27 = arith.constant 0 : index
    %45 = vector.load %arg2[%c0_25, %c0_26, %c0_27] : memref<1x16x16xf32, #tpu.memory_space<vmem>>, vector<1x16x16xf32>
    %46 = vector.shape_cast %45 : vector<1x16x16xf32> to vector<16x16xf32>
    %cst_28 = arith.constant 0.000000e+00 : f32
    %47 = vector.broadcast %cst_28 : f32 to vector<16x128xf32>
    %48 = vector.extract_strided_slice %42 {offsets = [0, 0], sizes = [16, 32], strides = [1, 1]} : vector<16x128xbf16> to vector<16x32xbf16>
    %49 = vector.extract_strided_slice %43 {offsets = [0, 0], sizes = [16, 32], strides = [1, 1]} : vector<16x128xbf16> to vector<16x32xbf16>
    %50 = vector.extract_strided_slice %44 {offsets = [0, 0], sizes = [16, 32], strides = [1, 1]} : vector<16x128xbf16> to vector<16x32xbf16>
    %cst_29 = arith.constant dense<0.000000e+00> : vector<16x16xf32>
    %51 = tpu.matmul %48, %49, %cst_29 {dimension_numbers = #tpu.dot_dimension_numbers<[1], [1], [0], [0], [0, 0, 1, 0], [], []>} : vector<16x32xbf16>, vector<16x32xbf16>, vector<16x16xf32> -> vector<16x16xf32>
    %cst_30 = arith.constant 0.176776692 : f32
    %52 = vector.broadcast %cst_30 : f32 to vector<16x16xf32>
    %53 = arith.mulf %51, %52 : vector<16x16xf32>
    %54 = arith.addf %53, %46 : vector<16x16xf32>
    %cst_31 = arith.constant dense<0xFF800000> : vector<16xf32>
    %55 = vector.multi_reduction <maximumf>, %54, %cst_31 [1] : vector<16x16xf32> to vector<16xf32>
    %56 = vector.shape_cast %55 : vector<16xf32> to vector<16x1xf32>
    %57 = vector.broadcast %56 : vector<16x1xf32> to vector<16x16xf32>
    %58 = arith.subf %54, %57 : vector<16x16xf32>
    %59 = math.exp %58 : vector<16x16xf32>
    %cst_32 = arith.constant dense<0.000000e+00> : vector<16xf32>
    %60 = vector.multi_reduction <add>, %59, %cst_32 [1] : vector<16x16xf32> to vector<16xf32>
    %61 = vector.shape_cast %60 : vector<16xf32> to vector<16x1xf32>
    %62 = vector.broadcast %61 : vector<16x1xf32> to vector<16x16xf32>
    %63 = arith.divf %59, %62 : vector<16x16xf32>
    %64 = arith.truncf %63 : vector<16x16xf32> to vector<16x16xbf16>
    %cst_33 = arith.constant dense<0.000000e+00> : vector<16x32xf32>
    %65 = tpu.matmul %64, %50, %cst_33 {dimension_numbers = #tpu.dot_dimension_numbers<[1], [0], [0], [1], [0, 0, 1, 1], [], []>} : vector<16x16xbf16>, vector<16x32xbf16>, vector<16x32xf32> -> vector<16x32xf32>
    %66 = arith.truncf %65 : vector<16x32xf32> to vector<16x32xbf16>
    %c0_34 = arith.constant 0 : index
    %c0_35 = arith.constant 0 : index
    %67 = vector.load %arg11[%c0_34, %c0_35] : memref<128x128xbf16, #tpu.memory_space<vmem>>, vector<32x128xbf16>
    %cst_36 = arith.constant dense<0.000000e+00> : vector<16x128xf32>
    %68 = tpu.matmul %66, %67, %cst_36 {dimension_numbers = #tpu.dot_dimension_numbers<[1], [0], [0], [1], [0, 0, 1, 1], [], []>} : vector<16x32xbf16>, vector<32x128xbf16>, vector<16x128xf32> -> vector<16x128xf32>
    %69 = arith.addf %47, %68 : vector<16x128xf32>
    %70 = vector.extract_strided_slice %42 {offsets = [0, 32], sizes = [16, 32], strides = [1, 1]} : vector<16x128xbf16> to vector<16x32xbf16>
    %71 = vector.extract_strided_slice %43 {offsets = [0, 32], sizes = [16, 32], strides = [1, 1]} : vector<16x128xbf16> to vector<16x32xbf16>
    %72 = vector.extract_strided_slice %44 {offsets = [0, 32], sizes = [16, 32], strides = [1, 1]} : vector<16x128xbf16> to vector<16x32xbf16>
    %cst_37 = arith.constant dense<0.000000e+00> : vector<16x16xf32>
    %73 = tpu.matmul %70, %71, %cst_37 {dimension_numbers = #tpu.dot_dimension_numbers<[1], [1], [0], [0], [0, 0, 1, 0], [], []>} : vector<16x32xbf16>, vector<16x32xbf16>, vector<16x16xf32> -> vector<16x16xf32>
    %cst_38 = arith.constant 0.176776692 : f32
    %74 = vector.broadcast %cst_38 : f32 to vector<16x16xf32>
    %75 = arith.mulf %73, %74 : vector<16x16xf32>
    %76 = arith.addf %75, %46 : vector<16x16xf32>
    %cst_39 = arith.constant dense<0xFF800000> : vector<16xf32>
    %77 = vector.multi_reduction <maximumf>, %76, %cst_39 [1] : vector<16x16xf32> to vector<16xf32>
    %78 = vector.shape_cast %77 : vector<16xf32> to vector<16x1xf32>
    %79 = vector.broadcast %78 : vector<16x1xf32> to vector<16x16xf32>
    %80 = arith.subf %76, %79 : vector<16x16xf32>
    %81 = math.exp %80 : vector<16x16xf32>
    %cst_40 = arith.constant dense<0.000000e+00> : vector<16xf32>
    %82 = vector.multi_reduction <add>, %81, %cst_40 [1] : vector<16x16xf32> to vector<16xf32>
    %83 = vector.shape_cast %82 : vector<16xf32> to vector<16x1xf32>
    %84 = vector.broadcast %83 : vector<16x1xf32> to vector<16x16xf32>
    %85 = arith.divf %81, %84 : vector<16x16xf32>
    %86 = arith.truncf %85 : vector<16x16xf32> to vector<16x16xbf16>
    %cst_41 = arith.constant dense<0.000000e+00> : vector<16x32xf32>
    %87 = tpu.matmul %86, %72, %cst_41 {dimension_numbers = #tpu.dot_dimension_numbers<[1], [0], [0], [1], [0, 0, 1, 1], [], []>} : vector<16x16xbf16>, vector<16x32xbf16>, vector<16x32xf32> -> vector<16x32xf32>
    %88 = arith.truncf %87 : vector<16x32xf32> to vector<16x32xbf16>
    %c32 = arith.constant 32 : index
    %c0_42 = arith.constant 0 : index
    %89 = vector.load %arg11[%c32, %c0_42] : memref<128x128xbf16, #tpu.memory_space<vmem>>, vector<32x128xbf16>
    %cst_43 = arith.constant dense<0.000000e+00> : vector<16x128xf32>
    %90 = tpu.matmul %88, %89, %cst_43 {dimension_numbers = #tpu.dot_dimension_numbers<[1], [0], [0], [1], [0, 0, 1, 1], [], []>} : vector<16x32xbf16>, vector<32x128xbf16>, vector<16x128xf32> -> vector<16x128xf32>
    %91 = arith.addf %69, %90 : vector<16x128xf32>
    %92 = vector.extract_strided_slice %42 {offsets = [0, 64], sizes = [16, 32], strides = [1, 1]} : vector<16x128xbf16> to vector<16x32xbf16>
    %93 = vector.extract_strided_slice %43 {offsets = [0, 64], sizes = [16, 32], strides = [1, 1]} : vector<16x128xbf16> to vector<16x32xbf16>
    %94 = vector.extract_strided_slice %44 {offsets = [0, 64], sizes = [16, 32], strides = [1, 1]} : vector<16x128xbf16> to vector<16x32xbf16>
    %cst_44 = arith.constant dense<0.000000e+00> : vector<16x16xf32>
    %95 = tpu.matmul %92, %93, %cst_44 {dimension_numbers = #tpu.dot_dimension_numbers<[1], [1], [0], [0], [0, 0, 1, 0], [], []>} : vector<16x32xbf16>, vector<16x32xbf16>, vector<16x16xf32> -> vector<16x16xf32>
    %cst_45 = arith.constant 0.176776692 : f32
    %96 = vector.broadcast %cst_45 : f32 to vector<16x16xf32>
    %97 = arith.mulf %95, %96 : vector<16x16xf32>
    %98 = arith.addf %97, %46 : vector<16x16xf32>
    %cst_46 = arith.constant dense<0xFF800000> : vector<16xf32>
    %99 = vector.multi_reduction <maximumf>, %98, %cst_46 [1] : vector<16x16xf32> to vector<16xf32>
    %100 = vector.shape_cast %99 : vector<16xf32> to vector<16x1xf32>
    %101 = vector.broadcast %100 : vector<16x1xf32> to vector<16x16xf32>
    %102 = arith.subf %98, %101 : vector<16x16xf32>
    %103 = math.exp %102 : vector<16x16xf32>
    %cst_47 = arith.constant dense<0.000000e+00> : vector<16xf32>
    %104 = vector.multi_reduction <add>, %103, %cst_47 [1] : vector<16x16xf32> to vector<16xf32>
    %105 = vector.shape_cast %104 : vector<16xf32> to vector<16x1xf32>
    %106 = vector.broadcast %105 : vector<16x1xf32> to vector<16x16xf32>
    %107 = arith.divf %103, %106 : vector<16x16xf32>
    %108 = arith.truncf %107 : vector<16x16xf32> to vector<16x16xbf16>
    %cst_48 = arith.constant dense<0.000000e+00> : vector<16x32xf32>
    %109 = tpu.matmul %108, %94, %cst_48 {dimension_numbers = #tpu.dot_dimension_numbers<[1], [0], [0], [1], [0, 0, 1, 1], [], []>} : vector<16x16xbf16>, vector<16x32xbf16>, vector<16x32xf32> -> vector<16x32xf32>
    %110 = arith.truncf %109 : vector<16x32xf32> to vector<16x32xbf16>
    %c64 = arith.constant 64 : index
    %c0_49 = arith.constant 0 : index
    %111 = vector.load %arg11[%c64, %c0_49] : memref<128x128xbf16, #tpu.memory_space<vmem>>, vector<32x128xbf16>
    %cst_50 = arith.constant dense<0.000000e+00> : vector<16x128xf32>
    %112 = tpu.matmul %110, %111, %cst_50 {dimension_numbers = #tpu.dot_dimension_numbers<[1], [0], [0], [1], [0, 0, 1, 1], [], []>} : vector<16x32xbf16>, vector<32x128xbf16>, vector<16x128xf32> -> vector<16x128xf32>
    %113 = arith.addf %91, %112 : vector<16x128xf32>
    %114 = vector.extract_strided_slice %42 {offsets = [0, 96], sizes = [16, 32], strides = [1, 1]} : vector<16x128xbf16> to vector<16x32xbf16>
    %115 = vector.extract_strided_slice %43 {offsets = [0, 96], sizes = [16, 32], strides = [1, 1]} : vector<16x128xbf16> to vector<16x32xbf16>
    %116 = vector.extract_strided_slice %44 {offsets = [0, 96], sizes = [16, 32], strides = [1, 1]} : vector<16x128xbf16> to vector<16x32xbf16>
    %cst_51 = arith.constant dense<0.000000e+00> : vector<16x16xf32>
    %117 = tpu.matmul %114, %115, %cst_51 {dimension_numbers = #tpu.dot_dimension_numbers<[1], [1], [0], [0], [0, 0, 1, 0], [], []>} : vector<16x32xbf16>, vector<16x32xbf16>, vector<16x16xf32> -> vector<16x16xf32>
    %cst_52 = arith.constant 0.176776692 : f32
    %118 = vector.broadcast %cst_52 : f32 to vector<16x16xf32>
    %119 = arith.mulf %117, %118 : vector<16x16xf32>
    %120 = arith.addf %119, %46 : vector<16x16xf32>
    %cst_53 = arith.constant dense<0xFF800000> : vector<16xf32>
    %121 = vector.multi_reduction <maximumf>, %120, %cst_53 [1] : vector<16x16xf32> to vector<16xf32>
    %122 = vector.shape_cast %121 : vector<16xf32> to vector<16x1xf32>
    %123 = vector.broadcast %122 : vector<16x1xf32> to vector<16x16xf32>
    %124 = arith.subf %120, %123 : vector<16x16xf32>
    %125 = math.exp %124 : vector<16x16xf32>
    %cst_54 = arith.constant dense<0.000000e+00> : vector<16xf32>
    %126 = vector.multi_reduction <add>, %125, %cst_54 [1] : vector<16x16xf32> to vector<16xf32>
    %127 = vector.shape_cast %126 : vector<16xf32> to vector<16x1xf32>
    %128 = vector.broadcast %127 : vector<16x1xf32> to vector<16x16xf32>
    %129 = arith.divf %125, %128 : vector<16x16xf32>
    %130 = arith.truncf %129 : vector<16x16xf32> to vector<16x16xbf16>
    %cst_55 = arith.constant dense<0.000000e+00> : vector<16x32xf32>
    %131 = tpu.matmul %130, %116, %cst_55 {dimension_numbers = #tpu.dot_dimension_numbers<[1], [0], [0], [1], [0, 0, 1, 1], [], []>} : vector<16x16xbf16>, vector<16x32xbf16>, vector<16x32xf32> -> vector<16x32xf32>
    %132 = arith.truncf %131 : vector<16x32xf32> to vector<16x32xbf16>
    %c96 = arith.constant 96 : index
    %c0_56 = arith.constant 0 : index
    %133 = vector.load %arg11[%c96, %c0_56] : memref<128x128xbf16, #tpu.memory_space<vmem>>, vector<32x128xbf16>
    %cst_57 = arith.constant dense<0.000000e+00> : vector<16x128xf32>
    %134 = tpu.matmul %132, %133, %cst_57 {dimension_numbers = #tpu.dot_dimension_numbers<[1], [0], [0], [1], [0, 0, 1, 1], [], []>} : vector<16x32xbf16>, vector<32x128xbf16>, vector<16x128xf32> -> vector<16x128xf32>
    %135 = arith.addf %113, %134 : vector<16x128xf32>
    %c0_58 = arith.constant 0 : index
    %c0_59 = arith.constant 0 : index
    %136 = vector.load %arg12[%c0_58, %c0_59] : memref<1x128xf32, #tpu.memory_space<vmem>>, vector<1x128xf32>
    %137 = vector.broadcast %136 : vector<1x128xf32> to vector<16x128xf32>
    %138 = arith.addf %135, %137 : vector<16x128xf32>
    %139 = arith.addf %1, %138 : vector<16x128xf32>
    %c0_60 = arith.constant 0 : index
    %c0_61 = arith.constant 0 : index
    %c0_62 = arith.constant 0 : index
    %140 = vector.load %arg13[%c0_60, %c0_61, %c0_62] : memref<1x16x128xf32, #tpu.memory_space<vmem>>, vector<1x16x128xf32>
    %141 = vector.shape_cast %140 : vector<1x16x128xf32> to vector<16x128xf32>
    %142 = vector.shape_cast %139 : vector<16x128xf32> to vector<1x16x128xf32>
    tpu.vector_store %arg13[%c0_60, %c0_61, %c0_62], %142 {strides = array<i32>} : memref<1x16x128xf32, #tpu.memory_space<vmem>>, vector<1x16x128xf32>,
    return
  }
  func.func @transform_0(%arg0: i32) -> (i32, i32, i32) {
    %c0_i32 = arith.constant 0 : i32
    %c0_i32_0 = arith.constant 0 : i32
    %c0_i32_1 = arith.constant 0 : i32
    return %arg0, %c0_i32, %c0_i32_0 : i32, i32, i32
  }
  func.func @transform_1(%arg0: i32) -> (i32, i32, i32) {
    %c0_i32 = arith.constant 0 : i32
    %c0_i32_0 = arith.constant 0 : i32
    %c0_i32_1 = arith.constant 0 : i32
    return %arg0, %c0_i32, %c0_i32_0 : i32, i32, i32
  }
  func.func @transform_2(%arg0: i32) -> (i32, i32) {
    %c0_i32 = arith.constant 0 : i32
    %c0_i32_0 = arith.constant 0 : i32
    %c0_i32_1 = arith.constant 0 : i32
    return %c0_i32, %c0_i32_0 : i32, i32
  }
  func.func @transform_3(%arg0: i32) -> (i32, i32) {
    %c0_i32 = arith.constant 0 : i32
    %c0_i32_0 = arith.constant 0 : i32
    %c0_i32_1 = arith.constant 0 : i32
    return %c0_i32, %c0_i32_0 : i32, i32
  }
  func.func @transform_4(%arg0: i32) -> (i32, i32) {
    %c0_i32 = arith.constant 0 : i32
    %c0_i32_0 = arith.constant 0 : i32
    %c0_i32_1 = arith.constant 0 : i32
    return %c0_i32, %c0_i32_0 : i32, i32
  }
  func.func @transform_5(%arg0: i32) -> (i32, i32) {
    %c0_i32 = arith.constant 0 : i32
    %c0_i32_0 = arith.constant 0 : i32
    %c0_i32_1 = arith.constant 0 : i32
    return %c0_i32, %c0_i32_0 : i32, i32
  }
  func.func @transform_6(%arg0: i32) -> (i32, i32) {
    %c0_i32 = arith.constant 0 : i32
    %c0_i32_0 = arith.constant 0 : i32
    %c0_i32_1 = arith.constant 0 : i32
    return %c0_i32, %c0_i32_0 : i32, i32
  }
  func.func @transform_7(%arg0: i32) -> (i32, i32) {
    %c0_i32 = arith.constant 0 : i32
    %c0_i32_0 = arith.constant 0 : i32
    %c0_i32_1 = arith.constant 0 : i32
    return %c0_i32, %c0_i32_0 : i32, i32
  }
  func.func @transform_8(%arg0: i32) -> (i32, i32) {
    %c0_i32 = arith.constant 0 : i32
    %c0_i32_0 = arith.constant 0 : i32
    %c0_i32_1 = arith.constant 0 : i32
    return %c0_i32, %c0_i32_0 : i32, i32
  }
  func.func @transform_9(%arg0: i32) -> (i32, i32) {
    %c0_i32 = arith.constant 0 : i32
    %c0_i32_0 = arith.constant 0 : i32
    %c0_i32_1 = arith.constant 0 : i32
    return %c0_i32, %c0_i32_0 : i32, i32
  }
  func.func @transform_10(%arg0: i32) -> (i32, i32) {
    %c0_i32 = arith.constant 0 : i32
    %c0_i32_0 = arith.constant 0 : i32
    %c0_i32_1 = arith.constant 0 : i32
    return %c0_i32, %c0_i32_0 : i32, i32
  }
  func.func @transform_11(%arg0: i32) -> (i32, i32) {
    %c0_i32 = arith.constant 0 : i32
    %c0_i32_0 = arith.constant 0 : i32
    %c0_i32_1 = arith.constant 0 : i32
    return %c0_i32, %c0_i32_0 : i32, i32
  }
  func.func @transform_12(%arg0: i32) -> (i32, i32, i32) {
    %c0_i32 = arith.constant 0 : i32
    %c0_i32_0 = arith.constant 0 : i32
    %c0_i32_1 = arith.constant 0 : i32
    return %arg0, %c0_i32, %c0_i32_0 : i32, i32, i32
  }
}

</mosaic_0001>

<bundles_post_ra>
// kernel: tpu_custom_call.1
= control target key start
LH: loop header
LB: loop body
LE: loop exit
PB: predicated region body
PF: predicated region fallthrough
CT: control target
= control target key end

     0   :  { %s3137_s0 = inlined_call_operand.hbm [shape: f32[2,16,128], index: 0, kind: input, shape index: {}]   ;;  %s3138_s1 = inlined_call_operand.hbm [shape: f32[2,16,16], index: 1, kind: input, shape index: {}]   ;;  %s3139_s2 = inlined_call_operand.vmem [shape: f32[1,128], index: 2, kind: input, shape index: {}]   ;;  %s3140_s3 = inlined_call_operand.vmem [shape: f32[1,128], index: 3, kind: input, shape index: {}]   ;;  %s3141_s4 = inlined_call_operand.hbm [shape: bf16[128,128], index: 4, kind: input, shape index: {}]   ;;  %s3142_s5 = inlined_call_operand.vmem [shape: f32[1,128], index: 5, kind: input, shape index: {}]   ;;  %s3143_s6 = inlined_call_operand.hbm [shape: bf16[128,128], index: 6, kind: input, shape index: {}]   ;;  %s3144_s7 = inlined_call_operand.vmem [shape: f32[1,128], index: 7, kind: input, shape index: {}]   ;;  %s3145_s8 = inlined_call_operand.hbm [shape: bf16[128,128], index: 8, kind: input, shape index: {}]   ;;  %s3146_s9 = inlined_call_operand.vmem [shape: f32[1,128], index: 9, kind: input, shape index: {}]   ;;  %s3147_s10 = inlined_call_operand.hbm [shape: bf16[128,128], index: 10, kind: input, shape index: {}]   ;;  %s3148_s11 = inlined_call_operand.vmem [shape: f32[1,128], index: 11, kind: input, shape index: {}]   ;;  %s3149_s12 = inlined_call_operand.hbm [shape: f32[2,16,128], index: 12, kind: output, shape index: {}]  }
   0x1   :  { %3156 = sst [smem:[#allocation22_spill]] %s3137_s0 }
   0x2   :  { %3157 = sst [smem:[#allocation23_spill]] %s3141_s4 }
   0x3   :  { %3158 = sst [smem:[#allocation24_spill]] %s3143_s6 }
   0x4   :  { %3159 = sst [smem:[#allocation25_spill]] %s3144_s7 }
   0x5   :  { %3160 = sst [smem:[#allocation26_spill]] %s3146_s9 }
   0x6   :  { %3161 = sst [smem:[#allocation27_spill]] %s3148_s11 }
   0x7   :  { %3162 = sst [smem:[#allocation28_spill]] %s3149_s12 }
   0x8   :  { %17 = vsyncpa [#allocation3], 0 }
   0x9   :  { %19 = vsyncpa [#allocation3 + $0x1], 0 }
   0xa   :  { %20 = vsyncpa [#allocation6], 0 }
   0xb   :  { %22 = vsyncpa [#allocation6 + $0x1], 0 }
   0xc   :  { %23 = vsyncpa [#allocation9], 0 }
   0xd   :  { %24 = vsyncpa [#allocation12], 0 }
   0xe   :  { %25 = vsyncpa [#allocation4], 0 }
   0xf   :  { %27 = vsyncpa [#allocation4 + $0x1], 0  ;;  %s2607_s21 = smov 0   ;;  %s2609_s22 = smov 0  }
  0x10   :  { %s2611_s23 = smov 0   ;;  %s2613_s24 = smov 0  }
  0x11 LB: > { %3163 = sst [smem:[#allocation20_spill]] %s2510_s21  ;;  %s2628_s25 = sadd.s32 4294967295, %s2522_s24   ;;  %s2522_s24 = sphi %s2613_s24, %s3196_s24   ;;  %s2518_s23 = sphi %s2611_s23, %s3195_s23   ;;  %s2514_s22 = sphi %s2609_s22, %s3194_s22   ;;  %s2510_s21 = sphi %s2607_s21, %s3193_s21  }
  0x12   : > { %s1823_s26 = sadd.s32 4294967294, %s2522_s24   ;;  %p53_p0 = scmp.ne.s32.totalorder %s2514_s22, %s2510_s21 }
  0x13   : > { %p3152_p1 = scmp.eq.s32.totalorder %s2628_s25, 0  ;;  %p319_p3 = scmp.eq.s32.totalorder %s1823_s26, 1 }
  0x14   : > { %p1824_p5 = scmp.ge.s32.totalorder %s2522_s24, 1  ;;  %p326_p7 = scmp.lt.s32.totalorder %s2522_s24, 3 }
  0x15   : > { %p2637_p4 = por %p3152_p1, %p53_p0  ;;  %p2642_p6 = por %p319_p3, %p53_p0 }
  0x16   : > { %p2647_p8 = pnand %p1824_p5, %p326_p7  ;;  %s2524_s30 = smov [#allocation7]  }
  0x17   : > { %s3164_s27 = scalar_select %p2637_p4, 1, 0 }
  0x18   : > { %s3165_s28 = scalar_select %p2642_p6, 1, 0 }
  0x19   : > { %s3167_s29 = scalar_select %p2647_p8, 1, 0 }
  0x1a   : > { %3166 = sst [smem:[#allocation21_spill]] %s3165_s28  ;;  %s344_s13 = sshll.u32 %s2524_s30, 4  ;;  %s2651_s13 = int_to_ptr.vmem [resolvable:$true] %s344_s13 }
  0x1b   : > { %p2119_p9 = pneg %p2647_p8  ;;  %s2525_s15 = smov [#allocation8]  }
  0x1c   : > { %s360_s16 = sshll.u32 %s2525_s15, 4  ;;  %s2526_s17 = smov [#allocation10]   ;;  %s2662_s16 = int_to_ptr.vmem [resolvable:$true] %s360_s16 }
  0x1d   : > { %p2658_p11 = pnand %p2119_p9, %p3152_p1  ;;  %s2664_s18 = sshll.u32 %s2526_s17, 4  ;;  %s377_s18 = int_to_ptr.vmem [resolvable:$true] %s2664_s18 }
  0x1e   : > { %s3169_s4 = sld [smem:[#allocation23_spill]] }
  0x1f   : > { %p2674_p13 = pneg %p2658_p11 }
  0x24   : > { %s2268_s26 = scalar_lea.hbm %s3169_s4, 1024 }
  0x25   : > { %p2269_p12 = scmp.ne.s32.totalorder %s3169_s4, %s2268_s26  ;;  %p2275_p5 = scmp.lt.u32.totalorder %s2268_s26, %s3169_s4 }
  0x27   : > { %p2271_p0 = pnand %p2674_p13, %p2269_p12 }
  0x29   : > { %p2272_p3 = pneg %p2271_p0 }
  0x2b   : > { %p2277_p7 = pnand %p2275_p5, %p2272_p3 }
  0x2d   : > { %2280 = shalt.err (!%p2277_p7)
}
  0x2e   : > { %s2281_s28 = scalar_lea.vmem %s2651_s13, 1024  ;;  %p2289_p2 = scmp.lt.s32.totalorder %s2651_s13, %s2651_s13 }
  0x2f   : > { %p2282_p9 = scmp.ne.s32.totalorder %s2651_s13, %s2281_s28  ;;  %p2290_p6 = scmp.lt.s32.totalorder %s2281_s28, %s2281_s28 }
  0x31   : > { %p2284_p10 = pnand %p2282_p9, %p2674_p13  ;;  %p2291_p12 = por %p2290_p6, %p2289_p2 }
  0x33   : > { %p2285_p1 = pneg %p2284_p10 }
  0x35   : > { %p2292_p0 = pnand %p2291_p12, %p2285_p1 }
  0x37   : > { %2295 = shalt.err (!%p2292_p0)
}
  0x38   : > { %s2527_s19 = smov 64   ;;  %s2528_s20 = smov 4  }
  0x39   : > { %2122 = dma.hbm_to_vmem [thread:$0]  (!%p2658_p11), %s3169_s4, 1024, %s2651_s13, [#allocation6], %s2527_s19, %s2527_s19, %s2528_s20  }
  0x3a   : > { %s3171_s6 = sld [smem:[#allocation24_spill]] }
  0x40   : > { %s2296_s28 = scalar_lea.hbm %s3171_s6, 1024 }
  0x41   : > { %p2297_p1 = scmp.ne.s32.totalorder %s3171_s6, %s2296_s28  ;;  %p2303_p10 = scmp.lt.u32.totalorder %s2296_s28, %s3171_s6 }
  0x43   : > { %p2299_p2 = pnand %p2297_p1, %p2674_p13 }
  0x45   : > { %p2300_p6 = pneg %p2299_p2 }
  0x47   : > { %p2305_p3 = pnand %p2303_p10, %p2300_p6 }
  0x49   : > { %2308 = shalt.err (!%p2305_p3)
}
  0x4a   : > { %s2309_s13 = scalar_lea.vmem %s2662_s16, 1024  ;;  %p2317_p12 = scmp.lt.s32.totalorder %s2662_s16, %s2662_s16 }
  0x4b   : > { %p2310_p5 = scmp.ne.s32.totalorder %s2662_s16, %s2309_s13  ;;  %p2318_p0 = scmp.lt.s32.totalorder %s2309_s13, %s2309_s13 }
  0x4d   : > { %p2312_p7 = pnand %p2310_p5, %p2674_p13  ;;  %p2319_p1 = por %p2318_p0, %p2317_p12 }
  0x4f   : > { %p2313_p9 = pneg %p2312_p7 }
  0x51   : > { %p2320_p2 = pnand %p2319_p1, %p2313_p9 }
  0x53   : > { %2323 = shalt.err (!%p2320_p2)
}
  0x54   : > { %2125 = dma.hbm_to_vmem [thread:$0]  (!%p2658_p11), %s3171_s6, 1024, %s2662_s16, [#allocation9], %s2527_s19, %s2527_s19, %s2528_s20  }
  0x55   : > { %s2324_s26 = scalar_lea.hbm %s3145_s8, 1024 }
  0x56   : > { %p2325_p6 = scmp.ne.s32.totalorder %s3145_s8, %s2324_s26  ;;  %p2331_p5 = scmp.lt.u32.totalorder %s2324_s26, %s3145_s8 }
  0x58   : > { %p2327_p10 = pnand %p2325_p6, %p2674_p13 }
  0x5a   : > { %p2328_p3 = pneg %p2327_p10 }
  0x5c   : > { %p2333_p7 = pnand %p2331_p5, %p2328_p3 }
  0x5e   : > { %2336 = shalt.err (!%p2333_p7)
}
  0x5f   : > { %s2337_s13 = scalar_lea.vmem %s377_s18, 1024  ;;  %p2345_p1 = scmp.lt.s32.totalorder %s377_s18, %s377_s18 }
  0x60   : > { %p2338_p9 = scmp.ne.s32.totalorder %s377_s18, %s2337_s13  ;;  %p2346_p2 = scmp.lt.s32.totalorder %s2337_s13, %s2337_s13 }
  0x62   : > { %p2340_p12 = pnand %p2338_p9, %p2674_p13  ;;  %p2347_p4 = por %p2346_p2, %p2345_p1 }
  0x64   : > { %p2341_p0 = pneg %p2340_p12 }
  0x66   : > { %p2348_p8 = pnand %p2347_p4, %p2341_p0 }
  0x68   : > { %2351 = shalt.err (!%p2348_p8)
}
  0x69   : > { %2128 = dma.hbm_to_vmem [thread:$0]  (!%p2658_p11), %s3145_s8, 1024, %s377_s18, [#allocation9], %s2527_s19, %s2527_s19, %s2528_s20  }
  0x6a   : > { %s2529_s9 = smov [#allocation11]   ;;  %s2352_s30 = scalar_lea.hbm %s3147_s10, 1024 }
  0x6b   : > { %s392_s11 = sshll.u32 %s2529_s9, 4  ;;  %p2353_p4 = scmp.ne.s32.totalorder %s3147_s10, %s2352_s30  ;;  %s393_s11 = int_to_ptr.vmem [resolvable:$true] %s392_s11 }
  0x6c   : > { %p2359_p10 = scmp.lt.u32.totalorder %s2352_s30, %s3147_s10 }
  0x6d   : > { %p2355_p8 = pnand %p2353_p4, %p2674_p13 }
  0x6f   : > { %p2356_p6 = pneg %p2355_p8 }
  0x71   : > { %p2361_p3 = pnand %p2359_p10, %p2356_p6 }
  0x73   : > { %2364 = shalt.err (!%p2361_p3)
}
  0x74   : > { %s2365_s18 = scalar_lea.vmem %s393_s11, 1024  ;;  %p2373_p12 = scmp.lt.s32.totalorder %s393_s11, %s393_s11 }
  0x75   : > { %p2366_p5 = scmp.ne.s32.totalorder %s393_s11, %s2365_s18  ;;  %p2374_p0 = scmp.lt.s32.totalorder %s2365_s18, %s2365_s18 }
  0x77   : > { %p2368_p7 = pnand %p2366_p5, %p2674_p13  ;;  %p2375_p1 = por %p2374_p0, %p2373_p12 }
  0x79   : > { %p2369_p9 = pneg %p2368_p7 }
  0x7b   : > { %p2376_p2 = pnand %p2375_p1, %p2369_p9 }
  0x7d   : > { %2379 = shalt.err (!%p2376_p2)
}
  0x7e   : > { %2131 = dma.hbm_to_vmem [thread:$0]  (!%p2658_p11), %s3147_s10, 1024, %s393_s11, [#allocation12], %s2527_s19, %s2527_s19, %s2528_s20  }
  0x7f   : > { %s2768_s21 = sadd.s32 1, %s2522_s24   ;;  %s40_s14 = sadd.s32 1, %s2518_s23 }
  0x80   : > { %s37_s9 = ssub.s32 %s2522_s24, %s2768_s21  ;;  %p47_p13 = scmp.ne.s32.totalorder %s2518_s23, %s2514_s22 }
  0x81   : > { %p38_p4 = scmp.eq.s32.totalorder %s37_s9, 0  ;;  %p48_p8 = scmp.eq.s32.totalorder %s2522_s24, 0 }
  0x82   : > { %p3172_p6 = scmp.eq.s32.totalorder %s2628_s25, 1  ;;  %p2147_p3 = scmp.lt.s32.totalorder %s2522_s24, 2 }
  0x83   : > { %s2784_s26 = scalar_select %p38_p4, %s2518_s23, %s40_s14  }
  0x84   : > { %p2778_p10 = por %p3172_p6, %p47_p13  ;;  %p49_p5 = por %p48_p8, %p47_p13 }
  0x85   : > { %s409_s30 = sand.u32 1, %s2518_s23   ;;  %s1899_s19 = sshll.u32 %s2522_s24, 8 }
  0x86   : > { %s2787_s15 = sshll.u32 %s409_s30, 4  ;;  %s3174_s0 = sld [smem:[#allocation22_spill]] }
  0x87   : > { %s413_s28 = scalar_lea.vmem [#allocation2], %s2787_s15  ;;  %p2800_p11 = pnand %p2147_p3, %p49_p5 }
  0x88   : > { %s420_s13 = sshll.u32 %s413_s28, 4  ;;  %s2804_s16 = scalar_lea.sflag [#allocation3], %s409_s30  ;;  %s2798_s13 = int_to_ptr.vmem [resolvable:$true] %s420_s13 }
  0x89   : > { %p2382_p9 = pneg %p2800_p11 }
  0x8c   : > { %s2795_s17 = scalar_lea.hbm %s3174_s0, %s1899_s19  ;;  %s2385_s20 = scalar_lea.hbm %s3174_s0, 512 }
  0x8d   : > { %s2380_s7 = scalar_lea.hbm %s2795_s17, 256  ;;  %p2386_p1 = scmp.lt.u32.totalorder %s2795_s17, %s3174_s0 }
  0x8e   : > { %p2381_p7 = scmp.ne.s32.totalorder %s2795_s17, %s2380_s7  ;;  %p2387_p2 = scmp.lt.u32.totalorder %s2385_s20, %s2380_s7 }
  0x8f   : > { %p2389_p4 = scmp.lt.u32.totalorder %s2380_s7, %s2795_s17 }
  0x90   : > { %p2383_p12 = pnand %p2382_p9, %p2381_p7  ;;  %p2388_p13 = por %p2387_p2, %p2386_p1 }
  0x92   : > { %p2384_p0 = pneg %p2383_p12  ;;  %p2390_p8 = por %p2389_p4, %p2388_p13 }
  0x94   : > { %p2391_p6 = pnand %p2390_p8, %p2384_p0 }
  0x96   : > { %2394 = shalt.err (!%p2391_p6)
}
  0x97   : > { %s2395_s30 = scalar_lea.vmem %s2798_s13, 256  ;;  %s2530_s14 = smov [#allocation2]  }
  0x98   : > { %p2396_p3 = scmp.ne.s32.totalorder %s2798_s13, %s2395_s30  ;;  %s2400_s9 = sshll.u32 %s2530_s14, 4  ;;  %s2401_s9 = int_to_ptr.vmem [resolvable:$false] %s2400_s9 }
  0x99   : > { %s2402_s11 = scalar_lea.vmem %s2401_s9, 512  ;;  %p2403_p12 = scmp.lt.s32.totalorder %s2798_s13, %s2401_s9 }
  0x9a   : > { %p2398_p5 = pnand %p2396_p3, %p2382_p9  ;;  %p2404_p1 = scmp.lt.s32.totalorder %s2402_s11, %s2395_s30 }
  0x9c   : > { %p2399_p7 = pneg %p2398_p5  ;;  %p2405_p2 = por %p2404_p1, %p2403_p12 }
  0x9e   : > { %p2406_p13 = pnand %p2405_p2, %p2399_p7 }
  0xa0   : > { %2409 = shalt.err (!%p2406_p13)
}
  0xa1   : > { %s2531_s7 = smov 128   ;;  %s2532_s20 = smov 8  }
  0xa2   : > { %2135 = dma.hbm_to_vmem [thread:$0]  (!%p2800_p11), %s2795_s17, 256, %s2798_s13, %s2804_s16, %s2531_s7, %s2531_s7, %s2532_s20  }
  0xa3   : > { %s2840_s14 = scalar_lea.hbm %s3138_s1, %s1899_s19  ;;  %s434_s9 = scalar_lea.vmem [#allocation5], %s2787_s15 }
  0xa4   : > { %s441_s11 = sshll.u32 %s434_s9, 4  ;;  %s430_s0 = sand.u32 1, %s2522_s24   ;;  %s2843_s11 = int_to_ptr.vmem [resolvable:$true] %s441_s11 }
  0xa5   : > { %s2846_s4 = scalar_lea.sflag [#allocation6], %s430_s0  ;;  %s2410_s6 = scalar_lea.hbm %s2840_s14, 256 }
  0xa6   : > { %p2411_p0 = scmp.ne.s32.totalorder %s2840_s14, %s2410_s6  ;;  %s2415_s13 = scalar_lea.hbm %s3138_s1, 512 }
  0xa7   : > { %p2416_p6 = scmp.lt.u32.totalorder %s2840_s14, %s3138_s1  ;;  %p2417_p3 = scmp.lt.u32.totalorder %s2415_s13, %s2410_s6 }
  0xa8   : > { %p2413_p4 = pnand %p2411_p0, %p2382_p9  ;;  %p2419_p7 = scmp.lt.u32.totalorder %s2410_s6, %s2840_s14 }
  0xa9   : > { %p2418_p5 = por %p2417_p3, %p2416_p6 }
  0xaa   : > { %p2414_p8 = pneg %p2413_p4 }
  0xab   : > { %p2420_p12 = por %p2419_p7, %p2418_p5 }
  0xad   : > { %p2421_p1 = pnand %p2420_p12, %p2414_p8 }
  0xaf   : > { %2424 = shalt.err (!%p2421_p1)
}
  0xb0   : > { %s2425_s0 = scalar_lea.vmem %s2843_s11, 256  ;;  %s2533_s15 = smov [#allocation5]  }
  0xb1   : > { %p2426_p2 = scmp.ne.s32.totalorder %s2843_s11, %s2425_s0  ;;  %s2430_s30 = sshll.u32 %s2533_s15, 4  ;;  %s2431_s30 = int_to_ptr.vmem [resolvable:$false] %s2430_s30 }
  0xb2   : > { %s2432_s9 = scalar_lea.vmem %s2431_s30, 512  ;;  %p2433_p4 = scmp.lt.s32.totalorder %s2843_s11, %s2431_s30 }
  0xb3   : > { %p2428_p13 = pnand %p2426_p2, %p2382_p9  ;;  %p2434_p6 = scmp.lt.s32.totalorder %s2432_s9, %s2425_s0 }
  0xb5   : > { %p2429_p0 = pneg %p2428_p13  ;;  %p2435_p3 = por %p2434_p6, %p2433_p4 }
  0xb7   : > { %p2436_p5 = pnand %p2435_p3, %p2429_p0 }
  0xb9   : > { %2439 = shalt.err (!%p2436_p5)
}
  0xba   : > { %2138 = dma.hbm_to_vmem [thread:$0]  (!%p2800_p11), %s2840_s14, 256, %s2843_s11, %s2846_s4, %s2531_s7, %s2531_s7, %s2532_s20  }
  0xbb   : > { %p3176_p9 = scmp.ne.s32.totalorder %s3167_s29, 0 }
  0xbc   : > { %s2878_s6 = sand.u32 (!%p3176_p9), 1, %s2514_s22   ;;  %p3177_p8 = scmp.ne.s32.totalorder (!%p3176_p9), %s3164_s27, 0 }
  0xbd   : > { %453 = sbr.rel (%p3176_p9) target bundleno = 3583 (0xdff), region = 68  ;;  %s2881_s17 = sshll.u32 (!%p3176_p9), %s2878_s6, 4 }
  0xbe   : > { %s456_s18 = scalar_lea.sflag (!%p3176_p9), [#allocation3], %s2878_s6  ;;  %s459_s19 = scalar_lea.vmem (!%p3176_p9), [#allocation2], %s2881_s17 }
  0xc4   : > { %2485 = dma.done.wait (%p3177_p8), %s456_s18, 256  }
  0xc5   : > { %2487 = vsyncadd (%p3177_p8), %s456_s18, 4294967040  ;;  %s464_s4 = sand.u32 1, %s2628_s25   ;;  %s468_s7 = scalar_lea.vmem [#allocation5], %s2881_s17 }
  0xc6   : > { %s465_s29 = scalar_lea.sflag [#allocation6], %s464_s4 }
  0xc7   : > { %2489 = dma.done.wait (%p3177_p8), %s465_s29, 256  }
  0xc8   : > { %2491 = vsyncadd (%p3177_p8), %s465_s29, 4294967040  ;;  %p3178_p11 = scmp.eq.s32.totalorder %s2628_s25, 0 }
  0xca   : > { %2493 = dma.done.wait (%p3178_p11), [#allocation6], 1024   ;;  %p3179_p7 = pmov %p3178_p11 }
  0xcc   : > { %2495 = vsyncadd (%p3179_p7), [#allocation6], 4294966272  ;;  %p3180_p12 = pmov %p3179_p7 }
  0xcd   : > { %p3181_p1 = pmov %p3179_p7 }
  0xce   : > { %2497 = dma.done.wait (%p3180_p12), [#allocation9], 2048  }
  0xcf   : > { %2499 = vsyncadd (%p3181_p1), [#allocation9], 4294965248  ;;  %p3182_p2 = pmov %p3181_p1 }
  0xd0   : > { %p3183_p13 = pmov %p3181_p1 }
  0xd1   : > { %2501 = dma.done.wait (%p3182_p2), [#allocation12], 1024  }
  0xd2   : > { %2503 = vsyncadd (%p3183_p13), [#allocation12], 4294966272  ;;  %v2907_v0 = vld [vmem:[%s459_s19] sm:$0xff]  ;;  %v2909_v1 = vld [vmem:[%s459_s19 + $0x8] sm:$0xff]  ;;  %v2534_v4 = vmov 0.0   ;;  %vm2535_vm0 = vmmov 0  }
  0xd3   : > { %533 = vadd.xlane.f32.xlu0 %v2907_v0  ;;  %v2200_v2 = vld [vmem:[#allocation7] sm:$0xff]   ;;  %1957 = vmatprep.subr.bf16.mxu0 %v2534_v4  ;;  %v2202_v5 = vld [vmem:[#allocation7 + $0x8] sm:$0xff]   ;;  %v2204_v15 = vld [vmem:[#allocation7 + $0x10] sm:$0xff]   ;;  %s3184_s15 = sld [smem:[#allocation25_spill]]  ;;  %vm916_vm1 = vcmask 261120   ;;  %s3185_s18 = sld [smem:[#allocation26_spill]] }
  0xd4   : > { %v2201_v3 = vld [vmem:[#allocation8] sm:$0xff]   ;;  %1977 = vmatprep.subr.bf16.mxu1 %v2534_v4  ;;  %1958 = vmatpush3.bf16.msra.mxu0 %v2200_v2  ;;  %v2203_v14 = vld [vmem:[#allocation8 + $0x8] sm:$0xff]   ;;  %v2205_v16 = vld [vmem:[#allocation8 + $0x10] sm:$0xff]   ;;  %vm968_vm2 = vcmask 130048   ;;  %s2536_s19 = smov 96   ;;  %s2537_s4 = smov 64  }
  0xd5   : > { %1978 = vmatpush3.bf16.msra.mxu1 %v2201_v3  ;;  %1959 = vmatprep.subr.bf16.mxu0 %v2534_v4  ;;  %v2206_v17 = vld [vmem:[#allocation7 + $0x18] sm:$0xff]   ;;  %v2208_v19 = vld [vmem:[#allocation7 + $0x20] sm:$0xff]   ;;  %v2210_v21 = vld [vmem:[#allocation7 + $0x28] sm:$0xff]   ;;  %s2538_s29 = smov 32   ;;  %s3186_s20 = sld [smem:[#allocation27_spill]] }
  0xd6   : > { %1979 = vmatprep.subr.bf16.mxu1 %v2534_v4  ;;  %v2207_v18 = vld [vmem:[#allocation8 + $0x18] sm:$0xff]   ;;  %v2209_v20 = vld [vmem:[#allocation8 + $0x20] sm:$0xff]   ;;  %1973 = vmatprep.mubr.msk.bf16.mxu0 %vm2535_vm0, %v2534_v4  ;;  %v2211_v22 = vld [vmem:[#allocation8 + $0x28] sm:$0xff]   ;;  %s529_s14 = scalar_lea.vmem [#allocation13], %s2881_s17  ;;  %s1901_s13 = sshll.u32 %s2628_s25, 8 }
  0xd7   : > { %535 = vadd.xlane.f32.xlu0 %v2909_v1  ;;  %1993 = vmatprep.mubr.msk.bf16.mxu1 %vm2535_vm0, %v2534_v4  ;;  %v2212_v23 = vld [vmem:[#allocation7 + $0x30] sm:$0xff]   ;;  %v2214_v25 = vld [vmem:[#allocation7 + $0x38] sm:$0xff]   ;;  %v1844_v35 = vld [vmem:[%s3139_s2] ss:$0 sm:$0xff]  ;;  %s1689_s11 = sshll.u32 %s529_s14, 4  ;;  %s3187_s0 = sld [smem:[#allocation28_spill]]  ;;  %s3087_s11 = int_to_ptr.vmem [resolvable:$true] %s1689_s11 }
  0xd8   : > { %1960 = vmatpush3.bf16.msra.mxu0 %v2202_v5  ;;  %v2213_v24 = vld [vmem:[#allocation8 + $0x30] sm:$0xff]   ;;  %v2215_v26 = vld [vmem:[#allocation8 + $0x38] sm:$0xff]   ;;  %v1845_v39 = vld [vmem:[%s3140_s3] ss:$0 sm:$0xff]  ;;  %s1676_s17 = scalar_lea.sflag [#allocation4], %s2878_s6  ;;  %s2440_s30 = scalar_lea.vmem %s3087_s11, 256 }
  0xd9   : > { %1961 = vmatprep.subr.bf16.mxu0 %v2534_v4  ;;  %1980 = vmatpush3.bf16.msra.mxu1 %v2203_v14  ;;  %v2216_v43 = vld [vmem:[#allocation10] sm:$0xff]   ;;  %v2217_v45 = vld [vmem:[#allocation10 + $0x8] sm:$0xff]   ;;  %v2218_v46 = vld [vmem:[#allocation10 + $0x10] sm:$0xff]   ;;  %p2441_p0 = scmp.ne.s32.totalorder %s3087_s11, %s2440_s30  ;;  %s2539_s25 = smov [#allocation13]  }
  0xda   : > { %1981 = vmatprep.subr.bf16.mxu1 %v2534_v4  ;;  %v2219_v47 = vld [vmem:[#allocation10 + $0x18] sm:$0xff]   ;;  %v2220_v48 = vld [vmem:[#allocation10 + $0x20] sm:$0xff]   ;;  %v2221_v49 = vld [vmem:[#allocation10 + $0x28] sm:$0xff]   ;;  %s2444_s9 = sshll.u32 %s2539_s25, 4  ;;  %s2445_s9 = int_to_ptr.vmem [resolvable:$false] %s2444_s9 }
  0xdb   : > { %v2222_v50 = vld [vmem:[#allocation10 + $0x30] sm:$0xff]   ;;  %v2223_v51 = vld [vmem:[#allocation10 + $0x38] sm:$0xff]   ;;  %v1846_v52 = vld [vmem:[%s3142_s5] ss:$0 sm:$0xff]  ;;  %p2442_p4 = pnand %p2441_p0, %p2778_p10  ;;  %p2447_p3 = scmp.lt.s32.totalorder %s3087_s11, %s2445_s9 }
  0xdc   : > { %1962 = vmatpush3.bf16.msra.mxu0 %v2204_v15  ;;  %v1855_v54 = vld [vmem:[%s3184_s15] ss:$0 sm:$0xff] }
  0xdd   : > { %1982 = vmatpush3.bf16.msra.mxu1 %v2205_v16  ;;  %1963 = vmatprep.subr.bf16.mxu0 %v2534_v4  ;;  %s3092_s15 = scalar_lea.hbm %s3187_s0, %s1901_s13  ;;  %p2443_p6 = pneg %p2442_p4 }
  0xde   : > { %1983 = vmatprep.subr.bf16.mxu1 %v2534_v4 }
  0xe0   : > { %1964 = vmatpush3.bf16.msra.mxu0 %v2206_v17  ;;  %v2983_v17 = vld [vmem:[%s468_s7] sm:$0xff] }
  0xe1   : > { %1984 = vmatpush3.bf16.msra.mxu1 %v2207_v18  ;;  %1965 = vmatprep.subr.bf16.mxu0 %v2534_v4 }
  0xe2   : > { %1985 = vmatprep.subr.bf16.mxu1 %v2534_v4 }
  0xe4   : > { %1966 = vmatpush3.bf16.msra.mxu0 %v2208_v19 }
  0xe5   : > { %1986 = vmatpush3.bf16.msra.mxu1 %v2209_v20  ;;  %1967 = vmatprep.subr.bf16.mxu0 %v2534_v4 }
  0xe6   : > { %1987 = vmatprep.subr.bf16.mxu1 %v2534_v4 }
  0xe8   : > { %1968 = vmatpush3.bf16.msra.mxu0 %v2210_v21  ;;  %v2987_v21 = vld [vmem:[%s468_s7 + $0x8] sm:$0xff] }
  0xe9   : > { %1988 = vmatpush3.bf16.msra.mxu1 %v2211_v22  ;;  %1969 = vmatprep.subr.bf16.mxu0 %v2534_v4 }
  0xea   : > { %1989 = vmatprep.subr.bf16.mxu1 %v2534_v4 }
  0xec   : > { %1970 = vmatpush3.bf16.msra.mxu0 %v2212_v23 }
  0xed   : > { %1990 = vmatpush3.bf16.msra.mxu1 %v2213_v24  ;;  %1971 = vmatprep.subr.bf16.mxu0 %v2534_v4 }
  0xee   : > { %1991 = vmatprep.subr.bf16.mxu1 %v2534_v4 }
  0xf0   : > { %1972 = vmatpush3.bf16.msra.mxu0 %v2214_v25 }
  0xf1   : > { %1992 = vmatpush3.bf16.msra.mxu1 %v2215_v26  ;;  %1997 = vmatprep.subr.bf16.mxu0 %v2534_v4 }
  0xf2   : > { %2017 = vmatprep.subr.bf16.mxu1 %v2534_v4 }
 0x160   : > { %v534_v6 = vpop.xlane.xlu0 %533 }
 0x161   : > { %v538_v7 = vmul.f32 0.0078125, %v534_v6 }
 0x163   : > { %v540_v8 = vsub.f32 %v2907_v0, %v538_v7 }
 0x164   : > { %v536_v9 = vpop.xlane.xlu0 %535 }
 0x165   : > { %v539_v10 = vmul.f32 0.0078125, %v536_v9  ;;  %v542_v11 = vmul.f32 %v540_v8, %v540_v8 }
 0x167   : > { %v541_v12 = vsub.f32 %v2909_v1, %v539_v10  ;;  %544 = vadd.xlane.f32.xlu1 %v542_v11 }
 0x169   : > { %v543_v13 = vmul.f32 %v541_v12, %v541_v12 }
 0x16b   : > { %546 = vadd.xlane.f32.xlu1 %v543_v13 }
 0x1f4   : > { %v545_v27 = vpop.xlane.xlu1 %544 }
 0x1f5   : > { %v548_v28 = vmul.f32 0.0078125, %v545_v27 }
 0x1f7   : > { %v550_v29 = vadd.f32 1e-06, %v548_v28 }
 0x1f8   : > { %v547_v30 = vpop.xlane.xlu1 %546 }
 0x1f9   : > { %2232 = vrsqrt.f32 %v550_v29  ;;  %v549_v31 = vmul.f32 0.0078125, %v547_v30 }
 0x1fb   : > { %v551_v32 = vadd.f32 1e-06, %v549_v31 }
 0x1fd   : > { %2234 = vrsqrt.f32 %v551_v32 }
 0x203   : > { %v2233_v33 = vpop.eup %2232 }
 0x204   : > { %v554_v34 = vmul.f32 %v2233_v33, %v540_v8  ;;  %v1864_v8 = vld [vmem:[%s3185_s18] ss:$0 sm:$0xff]  ;;  %s2446_s18 = scalar_lea.vmem %s2445_s9, 512 }
 0x205   : > { %p2448_p5 = scmp.lt.s32.totalorder %s2446_s18, %s2440_s30 }
 0x206   : > { %v563_v38 = vmul.f32 %v1844_v35, %v554_v34 }
 0x207   : > { %v2235_v36 = vpop.eup %2234  ;;  %p2449_p9 = por %p2448_p5, %p2447_p3 }
 0x208   : > { %v555_v37 = vmul.f32 %v2235_v36, %v541_v12  ;;  %v572_v41 = vadd.f32 %v1845_v39, %v563_v38 }
 0x209   : > { %p2450_p8 = pnand %p2449_p9, %p2443_p6 }
 0x20a   : > { %v564_v40 = vmul.f32 %v1844_v35, %v555_v37 }
 0x20c   : > { %v573_v42 = vadd.f32 %v1845_v39, %v564_v40 }
 0x20e   : > { %v574_v44 = vpack.c.bf16 %v573_v42, %v572_v41 }
 0x210   : > { %1974 = vmatmul.mubr.bf16.vlgmr.msra.gmra.mrb[0].mxu0 %v574_v44  ;;  %1994 = vmatmul.mubr.bf16.vlgmr.msra.gmra.mrb[0].mxu1 %v574_v44 }
 0x211   : > { %1998 = vmatpush3.bf16.msra.mxu0 %v2216_v43  ;;  %2013 = vmatprep.mubr.msk.bf16.mxu0 %vm2535_vm0, %v2534_v4 }
 0x212   : > { %1999 = vmatprep.subr.bf16.mxu0 %v2534_v4  ;;  %2019 = vmatprep.mubr.msk.bf16.mxu1 %vm2535_vm0, %v2534_v4 }
 0x215   : > { %2000 = vmatpush3.bf16.msra.mxu0 %v2217_v45 }
 0x216   : > { %2001 = vmatprep.subr.bf16.mxu0 %v2534_v4 }
 0x219   : > { %2002 = vmatpush3.bf16.msra.mxu0 %v2218_v46 }
 0x21a   : > { %2003 = vmatprep.subr.bf16.mxu0 %v2534_v4 }
 0x21d   : > { %2004 = vmatpush3.bf16.msra.mxu0 %v2219_v47 }
 0x21e   : > { %2005 = vmatprep.subr.bf16.mxu0 %v2534_v4 }
 0x221   : > { %2006 = vmatpush3.bf16.msra.mxu0 %v2220_v48 }
 0x222   : > { %2007 = vmatprep.subr.bf16.mxu0 %v2534_v4 }
 0x225   : > { %2008 = vmatpush3.bf16.msra.mxu0 %v2221_v49 }
 0x226   : > { %2009 = vmatprep.subr.bf16.mxu0 %v2534_v4 }
 0x229   : > { %2010 = vmatpush3.bf16.msra.mxu0 %v2222_v50 }
 0x22a   : > { %2011 = vmatprep.subr.bf16.mxu0 %v2534_v4 }
 0x22d   : > { %2012 = vmatpush3.bf16.msra.mxu0 %v2223_v51 }
 0x22e   : > { %2041 = vmatprep.subr.bf16.mxu0 %v2534_v4 }
 0x230   : > { %2014 = vmatmul.mubr.bf16.vlgmr.msra.gmra.mrb[4].mxu0 %v574_v44 }
 0x231   : > { %2045 = vmatprep.mubr.msk.bf16.mxu0 %vm2535_vm0, %v2534_v4 }
 0x2e3   : > { %v680_v53 = vpop.f32.mrb[0].mxu0  ;;  %v792_v55 = vpop.f32.mrb[0].mxu1 }
 0x2e4   : > { %v1975_v56 = vpop.f32.mrb[1].mxu0  ;;  %v1995_v57 = vpop.f32.mrb[1].mxu1  ;;  %v681_v60 = vadd.f32 %v1846_v52, %v680_v53  ;;  %v793_v61 = vadd.f32 %v1855_v54, %v792_v55 }
 0x2e5   : > { %v683_v58 = vpop.f32.mrb[2].mxu0  ;;  %v795_v59 = vpop.f32.mrb[2].mxu1 }
 0x2e6   : > { %v684_v62 = vadd.f32 %v1846_v52, %v683_v58  ;;  %v796_v63 = vadd.f32 %v1855_v54, %v795_v59  ;;  %v1976_v2 = vpop.f32.mrb[3].mxu0  ;;  %v1996_v3 = vpop.f32.mrb[3].mxu1 }
 0x2e8   : > { %v2963_v5 = vpack.c.bf16 %v684_v62, %v681_v60  ;;  %v2965_v6 = vpack.c.bf16 %v796_v63, %v793_v61 }
 0x2ea   : > { %v921_v7 = vsel %vm916_vm1, %v2965_v6, 0 }
 0x2eb   : > { %2018 = vmatpush3.bf16.xpose.msra.mxu1 %v921_v7 }
 0x2ec   : > { %2023 = vmatprep.subr.bf16.mxu1 %v2534_v4 }
 0x2f2   : > { %2020 = vmatmul.mubr.msk.bf16.vlgmr.msra.gmra.mrb[4].mxu1 %vm916_vm1, %v2963_v5 }
 0x2f3   : > { %2025 = vmatprep.mubr.msk.bf16.mxu1 %vm2535_vm0, %v2534_v4 }
 0x303   : > { %v904_v9 = vpop.f32.mrb[4].mxu0 }
 0x304   : > { %v2015_v10 = vpop.f32.mrb[5].mxu0  ;;  %v905_v12 = vadd.f32 %v1864_v8, %v904_v9 }
 0x305   : > { %v907_v11 = vpop.f32.mrb[6].mxu0 }
 0x306   : > { %v908_v13 = vadd.f32 %v1864_v8, %v907_v11  ;;  %v2016_v14 = vpop.f32.mrb[7].mxu0 }
 0x307   : > { %v2226_v14 = vld [vmem:[#allocation11 + $0x10] sm:$0xff]  }
 0x308   : > { %v2977_v15 = vpack.c.bf16 %v908_v13, %v905_v12  ;;  %2042 = vmatpush3.bf16.msra.mxu0 %v2226_v14 }
 0x309   : > { %2043 = vmatprep.subr.bf16.mxu0 %v2534_v4 }
 0x30a   : > { %2024 = vmatpush3.bf16.msra.mxu1 %v2977_v15 }
 0x30b   : > { %2029 = vmatprep.subr.bf16.mxu1 %v2534_v4 }
 0x3c5   : > { %v957_v16 = vpop.f32.mrb[4].mxu1 }
 0x3c6   : > { %v964_v18 = vmul.f32 0.17677669, %v957_v16  ;;  %v2021_v19 = vpop.f32.mrb[5].mxu1  ;;  %v2227_v16 = vld [vmem:[#allocation11 + $0x18] sm:$0xff]  }
 0x3c7   : > { %v960_v20 = vpop.f32.mrb[6].mxu1  ;;  %2044 = vmatpush3.bf16.msra.mxu0 %v2227_v16 }
 0x3c8   : > { %v965_v22 = vmul.f32 0.17677669, %v960_v20  ;;  %v2022_v23 = vpop.f32.mrb[7].mxu1  ;;  %v966_v24 = vadd.f32 %v964_v18, %v2983_v17  ;;  %2057 = vmatprep.subr.bf16.mxu0 %v2534_v4 }
 0x3ca   : > { %v969_v25 = vsel %vm968_vm2, %v966_v24, -inf  ;;  %v967_v26 = vadd.f32 %v965_v22, %v2987_v21 }
 0x3cb   : > { %970 = vmax.xlane.f32.xlu0 %v969_v25 }
 0x3cc   : > { %v972_v27 = vsel %vm968_vm2, %v967_v26, -inf }
 0x3cd   : > { %973 = vmax.xlane.f32.xlu1 %v972_v27 }
 0x458   : > { %v971_v28 = vpop.xlane.xlu0 %970 }
 0x459   : > { %v975_v29 = vsub.f32 %v966_v24, %v971_v28  ;;  %v2225_v28 = vld [vmem:[#allocation11 + $0x8] sm:$0xff]  }
 0x45a   : > { %v974_v30 = vpop.xlane.xlu1 %973 }
 0x45b   : > { %v977_v31 = vmul.f32 1.442695, %v975_v29  ;;  %v976_v32 = vsub.f32 %v967_v26, %v974_v30  ;;  %v2224_v26 = vld [vmem:[#allocation11] sm:$0xff]  }
 0x45d   : > { %2236 = vpow2.f32 %v977_v31  ;;  %v979_v33 = vmul.f32 1.442695, %v976_v32 }
 0x45f   : > { %2238 = vpow2.f32 %v979_v33 }
 0x467   : > { %v2237_v34 = vpop.eup %2236 }
 0x468   : > { %v981_v35 = vsel %vm968_vm2, %v2237_v34, 0.0 }
 0x469   : > { %v2239_v36 = vpop.eup %2238  ;;  %982 = vadd.xlane.f32.xlu0 %v981_v35 }
 0x46a   : > { %v984_v37 = vsel %vm968_vm2, %v2239_v36, 0.0 }
 0x46b   : > { %985 = vadd.xlane.f32.xlu1 %v984_v37 }
 0x47c   : > { %1042 = vrot.lane.b32.xlu1 %v2963_v5, %s2536_s19 }
 0x47f   : > { %1045 = vrot.lane.b32.xlu0 %v2965_v6, %s2536_s19 }
 0x4f6   : > { %v983_v38 = vpop.xlane.xlu0 %982 }
 0x4f7   : > { %2240 = vrcp.f32 %v983_v38 }
 0x4f8   : > { %v986_v39 = vpop.xlane.xlu1 %985 }
 0x4f9   : > { %2242 = vrcp.f32 %v986_v39 }
 0x4fa   : > { %v1046_v44 = vpop.permute.xlu0 %1045 }
 0x4fb   : > { %v1051_v46 = vsel %vm916_vm1, %v1046_v44, 0 }
 0x4fc   : > { %v1043_v47 = vpop.permute.xlu1 %1042 }
 0x501   : > { %v2241_v40 = vpop.eup %2240 }
 0x502   : > { %v988_v42 = vmul.f32 %v2241_v40, %v2237_v34 }
 0x503   : > { %v2243_v41 = vpop.eup %2242 }
 0x504   : > { %v990_v43 = vmul.f32 %v2243_v41, %v2239_v36 }
 0x506   : > { %v991_v45 = vpack.c.bf16 %v990_v43, %v988_v42 }
 0x508   : > { %2026 = vmatmul.mubr.msk.bf16.vlgmr.msra.gmra.mrb[8].mxu1 %vm968_vm2, %v991_v45 }
 0x509   : > { %2030 = vmatpush3.bf16.xpose.msra.mxu1 %v1051_v46  ;;  %2031 = vmatprep.mubr.msk.bf16.mxu1 %vm2535_vm0, %v2534_v4 }
 0x50a   : > { %2035 = vmatprep.subr.bf16.mxu1 %v2534_v4 }
 0x510   : > { %2032 = vmatmul.mubr.msk.bf16.vlgmr.msra.gmra.mrb[12].mxu1 %vm916_vm1, %v1043_v47 }
 0x511   : > { %2037 = vmatprep.mubr.msk.bf16.mxu1 %vm2535_vm0, %v2534_v4 }
 0x5db   : > { %v1029_v48 = vpop.f32.mrb[8].mxu1 }
 0x5dc   : > { %v2027_v49 = vpop.f32.mrb[9].mxu1 }
 0x5dd   : > { %v1032_v50 = vpop.f32.mrb[10].mxu1 }
 0x5de   : > { %v1036_v51 = vpack.c.bf16 %v1032_v50, %v1029_v48  ;;  %v2028_v52 = vpop.f32.mrb[11].mxu1 }
 0x5e3   : > { %v1087_v53 = vpop.f32.mrb[12].mxu1 }
 0x5e4   : > { %v1094_v54 = vmul.f32 0.17677669, %v1087_v53  ;;  %v2033_v55 = vpop.f32.mrb[13].mxu1 }
 0x5e5   : > { %v1090_v56 = vpop.f32.mrb[14].mxu1 }
 0x5e6   : > { %v1095_v57 = vmul.f32 0.17677669, %v1090_v56  ;;  %v2034_v58 = vpop.f32.mrb[15].mxu1  ;;  %v1096_v59 = vadd.f32 %v1094_v54, %v2983_v17 }
 0x5e8   : > { %v1098_v60 = vsel %vm968_vm2, %v1096_v59, -inf  ;;  %v1097_v61 = vadd.f32 %v1095_v57, %v2987_v21 }
 0x5e9   : > { %1099 = vmax.xlane.f32.xlu1 %v1098_v60 }
 0x5ea   : > { %v1101_v62 = vsel %vm968_vm2, %v1097_v61, -inf }
 0x5eb   : > { %1102 = vmax.xlane.f32.xlu0 %v1101_v62 }
 0x676   : > { %v1100_v63 = vpop.xlane.xlu1 %1099 }
 0x677   : > { %v1104_v2 = vsub.f32 %v1096_v59, %v1100_v63 }
 0x678   : > { %v1103_v3 = vpop.xlane.xlu0 %1102 }
 0x679   : > { %v1106_v7 = vmul.f32 1.442695, %v1104_v2  ;;  %v1105_v8 = vsub.f32 %v1097_v61, %v1103_v3 }
 0x67b   : > { %2244 = vpow2.f32 %v1106_v7  ;;  %v1108_v9 = vmul.f32 1.442695, %v1105_v8 }
 0x67d   : > { %2246 = vpow2.f32 %v1108_v9 }
 0x685   : > { %v2245_v10 = vpop.eup %2244 }
 0x686   : > { %v1110_v11 = vsel %vm968_vm2, %v2245_v10, 0.0 }
 0x687   : > { %v2247_v12 = vpop.eup %2246  ;;  %1111 = vadd.xlane.f32.xlu0 %v1110_v11 }
 0x688   : > { %v1113_v13 = vsel %vm968_vm2, %v2247_v12, 0.0 }
 0x689   : > { %1114 = vadd.xlane.f32.xlu1 %v1113_v13 }
 0x69a   : > { %1288 = vrot.lane.b32.xlu1 %v2965_v6, %s2537_s4 }
 0x69d   : > { %1122 = vrot.lane.b32.xlu0 %v2977_v15, %s2536_s19 }
 0x69e   : > { %1286 = vrot.lane.b32.xlu1 %v2963_v5, %s2537_s4 }
 0x714   : > { %v1112_v18 = vpop.xlane.xlu0 %1111 }
 0x715   : > { %2248 = vrcp.f32 %v1112_v18 }
 0x716   : > { %v1115_v19 = vpop.xlane.xlu1 %1114 }
 0x717   : > { %2250 = vrcp.f32 %v1115_v19 }
 0x718   : > { %v1123_v20 = vpop.permute.xlu0 %1122 }
 0x719   : > { %2036 = vmatpush3.bf16.msra.mxu1 %v1123_v20  ;;  %v2229_v20 = vld [vmem:[#allocation11 + $0x28] sm:$0xff]  }
 0x71a   : > { %2049 = vmatprep.subr.bf16.mxu1 %v2534_v4  ;;  %v1289_v31 = vpop.permute.xlu1 %1288 }
 0x71b   : > { %v1294_v35 = vsel %vm916_vm1, %v1289_v31, 0 }
 0x71e   : > { %v1287_v40 = vpop.permute.xlu1 %1286 }
 0x71f   : > { %v2249_v22 = vpop.eup %2248 }
 0x720   : > { %v1117_v24 = vmul.f32 %v2249_v22, %v2245_v10 }
 0x721   : > { %v2251_v23 = vpop.eup %2250 }
 0x722   : > { %v1119_v25 = vmul.f32 %v2251_v23, %v2247_v12 }
 0x724   : > { %v1120_v27 = vpack.c.bf16 %v1119_v25, %v1117_v24 }
 0x726   : > { %2038 = vmatmul.mubr.msk.bf16.vlgmr.msra.gmra.mrb[16].mxu1 %vm968_vm2, %v1120_v27 }
 0x727   : > { %2050 = vmatpush3.bf16.msra.mxu1 %v2224_v26  ;;  %2053 = vmatprep.mubr.msk.bf16.mxu1 %vm2535_vm0, %v2534_v4 }
 0x728   : > { %2051 = vmatprep.subr.bf16.mxu1 %v2534_v4 }
 0x72b   : > { %2052 = vmatpush3.bf16.msra.mxu1 %v2225_v28 }
 0x72c   : > { %2063 = vmatprep.subr.bf16.mxu1 %v2534_v4 }
 0x72e   : > { %2054 = vmatmul.mubr.msk.bf16.vlgmr.msra.gmra.mrb[20].mxu1 %vm916_vm1, %v1036_v51 }
 0x72f   : > { %2065 = vmatprep.mubr.msk.bf16.mxu1 %vm2535_vm0, %v2534_v4 }
 0x7f9   : > { %v1162_v29 = vpop.f32.mrb[16].mxu1 }
 0x7fa   : > { %v2039_v30 = vpop.f32.mrb[17].mxu1 }
 0x7fb   : > { %v1165_v32 = vpop.f32.mrb[18].mxu1 }
 0x7fc   : > { %v1169_v33 = vpack.c.bf16 %v1165_v32, %v1162_v29  ;;  %v2040_v34 = vpop.f32.mrb[19].mxu1 }
 0x7fe   : > { %2046 = vmatmul.mubr.msk.bf16.vlgmr.msra.gmra.mrb[8].mxu0 %vm916_vm1, %v1169_v33 }
 0x7ff   : > { %2058 = vmatpush3.bf16.xpose.msra.mxu0 %v1294_v35  ;;  %2059 = vmatprep.mubr.msk.bf16.mxu0 %vm2535_vm0, %v2534_v4 }
 0x800   : > { %2069 = vmatprep.subr.bf16.mxu0 %v2534_v4 }
 0x801   : > { %v1279_v36 = vpop.f32.mrb[20].mxu1 }
 0x802   : > { %v2055_v37 = vpop.f32.mrb[21].mxu1 }
 0x803   : > { %v1282_v38 = vpop.f32.mrb[22].mxu1 }
 0x804   : > { %v2056_v39 = vpop.f32.mrb[23].mxu1 }
 0x806   : > { %2060 = vmatmul.mubr.msk.bf16.vlgmr.msra.gmra.mrb[12].mxu0 %vm916_vm1, %v1287_v40 }
 0x807   : > { %2073 = vmatprep.mubr.msk.bf16.mxu0 %vm2535_vm0, %v2534_v4 }
 0x8d1   : > { %v1223_v41 = vpop.f32.mrb[8].mxu0 }
 0x8d2   : > { %v3038_v42 = vadd.f32 %v1279_v36, %v1223_v41  ;;  %v2047_v43 = vpop.f32.mrb[9].mxu0 }
 0x8d3   : > { %v1226_v44 = vpop.f32.mrb[10].mxu0 }
 0x8d4   : > { %v3040_v45 = vadd.f32 %v1282_v38, %v1226_v44  ;;  %v2048_v46 = vpop.f32.mrb[11].mxu0 }
 0x8d9   : > { %v1330_v47 = vpop.f32.mrb[12].mxu0 }
 0x8da   : > { %v1337_v48 = vmul.f32 0.17677669, %v1330_v47  ;;  %v2061_v49 = vpop.f32.mrb[13].mxu0 }
 0x8db   : > { %v1333_v50 = vpop.f32.mrb[14].mxu0 }
 0x8dc   : > { %v1338_v51 = vmul.f32 0.17677669, %v1333_v50  ;;  %v2062_v52 = vpop.f32.mrb[15].mxu0  ;;  %v1339_v53 = vadd.f32 %v1337_v48, %v2983_v17 }
 0x8de   : > { %v1341_v54 = vsel %vm968_vm2, %v1339_v53, -inf  ;;  %v1340_v55 = vadd.f32 %v1338_v51, %v2987_v21 }
 0x8df   : > { %1342 = vmax.xlane.f32.xlu1 %v1341_v54 }
 0x8e0   : > { %v1344_v56 = vsel %vm968_vm2, %v1340_v55, -inf }
 0x8e1   : > { %1345 = vmax.xlane.f32.xlu0 %v1344_v56 }
 0x8f0   : > { %1364 = vrot.lane.b32.xlu1 %v2977_v15, %s2537_s4 }
 0x8f4   : > { %1474 = vrot.lane.b32.xlu1 %v2963_v5, %s2538_s29  ;;  %v2228_v5 = vld [vmem:[#allocation11 + $0x20] sm:$0xff]  }
 0x8f5   : > { %2070 = vmatpush3.bf16.msra.mxu0 %v2228_v5 }
 0x8f6   : > { %2071 = vmatprep.subr.bf16.mxu0 %v2534_v4 }
 0x8f9   : > { %2072 = vmatpush3.bf16.msra.mxu0 %v2229_v20 }
 0x8fa   : > { %2083 = vmatprep.subr.bf16.mxu0 %v2534_v4 }
 0x96c   : > { %v1343_v57 = vpop.xlane.xlu1 %1342 }
 0x96d   : > { %v1347_v58 = vsub.f32 %v1339_v53, %v1343_v57 }
 0x96e   : > { %v1346_v59 = vpop.xlane.xlu0 %1345 }
 0x96f   : > { %v1349_v60 = vmul.f32 1.442695, %v1347_v58  ;;  %v1348_v61 = vsub.f32 %v1340_v55, %v1346_v59 }
 0x970   : > { %v1365_v62 = vpop.permute.xlu1 %1364 }
 0x971   : > { %2252 = vpow2.f32 %v1349_v60  ;;  %v1351_v63 = vmul.f32 1.442695, %v1348_v61  ;;  %2064 = vmatpush3.bf16.msra.mxu1 %v1365_v62 }
 0x972   : > { %2077 = vmatprep.subr.bf16.mxu1 %v2534_v4 }
 0x973   : > { %2254 = vpow2.f32 %v1351_v63 }
 0x97b   : > { %v2253_v2 = vpop.eup %2252 }
 0x97c   : > { %v1353_v3 = vsel %vm968_vm2, %v2253_v2, 0.0 }
 0x97d   : > { %v2255_v7 = vpop.eup %2254  ;;  %1354 = vadd.xlane.f32.xlu0 %v1353_v3  ;;  %v1893_v3 = vld [vmem:[%s3186_s20] ss:$0 sm:$0xff] }
 0x97e   : > { %v1356_v8 = vsel %vm968_vm2, %v2255_v7, 0.0 }
 0x981   : > { %1357 = vadd.xlane.f32.xlu0 %v1356_v8 }
 0x997   : > { %1476 = vrot.lane.b32.xlu0 %v2965_v6, %s2538_s29  ;;  %v1475_v6 = vpop.permute.xlu1 %1474 }
 0xa0a   : > { %v1355_v9 = vpop.xlane.xlu0 %1354 }
 0xa0b   : > { %2256 = vrcp.f32 %v1355_v9 }
 0xa0e   : > { %v1358_v10 = vpop.xlane.xlu0 %1357 }
 0xa0f   : > { %2258 = vrcp.f32 %v1358_v10 }
 0xa12   : > { %v1477_v16 = vpop.permute.xlu0 %1476 }
 0xa13   : > { %v1482_v19 = vsel %vm916_vm1, %v1477_v16, 0 }
 0xa15   : > { %v2257_v11 = vpop.eup %2256 }
 0xa16   : > { %v1360_v13 = vmul.f32 %v2257_v11, %v2253_v2 }
 0xa19   : > { %v2259_v12 = vpop.eup %2258 }
 0xa1a   : > { %v1362_v14 = vmul.f32 %v2259_v12, %v2255_v7 }
 0xa1c   : > { %v1363_v18 = vpack.c.bf16 %v1362_v14, %v1360_v13 }
 0xa1e   : > { %2066 = vmatmul.mubr.msk.bf16.vlgmr.msra.gmra.mrb[24].mxu1 %vm968_vm2, %v1363_v18 }
 0xa1f   : > { %2078 = vmatpush3.bf16.xpose.msra.mxu1 %v1482_v19  ;;  %2079 = vmatprep.mubr.msk.bf16.mxu1 %vm2535_vm0, %v2534_v4 }
 0xa20   : > { %2089 = vmatprep.subr.bf16.mxu1 %v2534_v4 }
 0xa26   : > { %2080 = vmatmul.mubr.msk.bf16.vlgmr.msra.gmra.mrb[28].mxu1 %vm916_vm1, %v1475_v6 }
 0xa27   : > { %2093 = vmatprep.mubr.msk.bf16.mxu1 %vm2535_vm0, %v2534_v4 }
 0xaf1   : > { %v1404_v22 = vpop.f32.mrb[24].mxu1 }
 0xaf2   : > { %v2067_v23 = vpop.f32.mrb[25].mxu1 }
 0xaf3   : > { %v1407_v24 = vpop.f32.mrb[26].mxu1 }
 0xaf4   : > { %v1411_v25 = vpack.c.bf16 %v1407_v24, %v1404_v22  ;;  %v2068_v26 = vpop.f32.mrb[27].mxu1 }
 0xaf6   : > { %2074 = vmatmul.mubr.msk.bf16.vlgmr.msra.gmra.mrb[16].mxu0 %vm916_vm1, %v1411_v25 }
 0xaf7   : > { %2085 = vmatprep.mubr.msk.bf16.mxu0 %vm2535_vm0, %v2534_v4 }
 0xaf9   : > { %v1518_v27 = vpop.f32.mrb[28].mxu1 }
 0xafa   : > { %v1525_v28 = vmul.f32 0.17677669, %v1518_v27  ;;  %v2081_v29 = vpop.f32.mrb[29].mxu1 }
 0xafb   : > { %v1521_v30 = vpop.f32.mrb[30].mxu1 }
 0xafc   : > { %v1526_v31 = vmul.f32 0.17677669, %v1521_v30  ;;  %v2082_v32 = vpop.f32.mrb[31].mxu1  ;;  %v1527_v33 = vadd.f32 %v1525_v28, %v2983_v17 }
 0xafe   : > { %v1529_v34 = vsel %vm968_vm2, %v1527_v33, -inf  ;;  %v1528_v35 = vadd.f32 %v1526_v31, %v2987_v21  ;;  %v2230_v21 = vld [vmem:[#allocation11 + $0x30] sm:$0xff]  }
 0xaff   : > { %1530 = vmax.xlane.f32.xlu1 %v1529_v34  ;;  %2090 = vmatpush3.bf16.msra.mxu1 %v2230_v21 }
 0xb00   : > { %v1532_v36 = vsel %vm968_vm2, %v1528_v35, -inf  ;;  %2091 = vmatprep.subr.bf16.mxu1 %v2534_v4 }
 0xb01   : > { %1533 = vmax.xlane.f32.xlu0 %v1532_v36 }
 0xb8c   : > { %v1531_v37 = vpop.xlane.xlu1 %1530 }
 0xb8d   : > { %v1535_v38 = vsub.f32 %v1527_v33, %v1531_v37 }
 0xb8e   : > { %v1534_v39 = vpop.xlane.xlu0 %1533 }
 0xb8f   : > { %v1537_v40 = vmul.f32 1.442695, %v1535_v38  ;;  %v1536_v41 = vsub.f32 %v1528_v35, %v1534_v39 }
 0xb91   : > { %2260 = vpow2.f32 %v1537_v40  ;;  %v1539_v43 = vmul.f32 1.442695, %v1536_v41 }
 0xb93   : > { %2262 = vpow2.f32 %v1539_v43 }
 0xb9b   : > { %v2261_v44 = vpop.eup %2260 }
 0xb9c   : > { %v1541_v46 = vsel %vm968_vm2, %v2261_v44, 0.0 }
 0xb9d   : > { %v2263_v17 = vpop.eup %2262  ;;  %1542 = vadd.xlane.f32.xlu0 %v1541_v46 }
 0xb9e   : > { %v1544_v47 = vsel %vm968_vm2, %v2263_v17, 0.0 }
 0xb9f   : > { %1545 = vadd.xlane.f32.xlu1 %v1544_v47 }
 0xbb3   : > { %1552 = vrot.lane.b32.xlu0 %v2977_v15, %s2538_s29 }
 0xbc9   : > { %v1465_v48 = vpop.f32.mrb[16].mxu0 }
 0xbca   : > { %v1472_v49 = vadd.f32 %v1465_v48, %v3038_v42  ;;  %v2075_v50 = vpop.f32.mrb[17].mxu0  ;;  %v2231_v42 = vld [vmem:[#allocation11 + $0x38] sm:$0xff]  }
 0xbcb   : > { %v1468_v51 = vpop.f32.mrb[18].mxu0  ;;  %2092 = vmatpush3.bf16.msra.mxu1 %v2231_v42 }
 0xbcc   : > { %v1473_v52 = vadd.f32 %v1468_v51, %v3040_v45  ;;  %v2076_v53 = vpop.f32.mrb[19].mxu0 }
 0xc2a   : > { %v1543_v54 = vpop.xlane.xlu0 %1542 }
 0xc2b   : > { %2264 = vrcp.f32 %v1543_v54 }
 0xc2c   : > { %v1546_v55 = vpop.xlane.xlu1 %1545 }
 0xc2d   : > { %2266 = vrcp.f32 %v1546_v55 }
 0xc2e   : > { %v1553_v56 = vpop.permute.xlu0 %1552 }
 0xc2f   : > { %2084 = vmatpush3.bf16.msra.mxu0 %v1553_v56 }
 0xc35   : > { %v2265_v57 = vpop.eup %2264 }
 0xc36   : > { %v1548_v58 = vmul.f32 %v2265_v57, %v2261_v44 }
 0xc37   : > { %v2267_v15 = vpop.eup %2266 }
 0xc38   : > { %v1550_v59 = vmul.f32 %v2267_v15, %v2263_v17 }
 0xc3a   : > { %v1551_v4 = vpack.c.bf16 %v1550_v59, %v1548_v58 }
 0xc3c   : > { %2086 = vmatmul.mubr.msk.bf16.vlgmr.msra.gmra.mrb[20].mxu0 %vm968_vm2, %v1551_v4 }
 0xd0f   : > { %v1592_v60 = vpop.f32.mrb[20].mxu0 }
 0xd10   : > { %v2087_v45 = vpop.f32.mrb[21].mxu0 }
 0xd11   : > { %v1595_v61 = vpop.f32.mrb[22].mxu0 }
 0xd12   : > { %v1599_v62 = vpack.c.bf16 %v1595_v61, %v1592_v60  ;;  %v2088_v63 = vpop.f32.mrb[23].mxu0 }
 0xd14   : > { %2094 = vmatmul.mubr.msk.bf16.vlgmr.msra.gmra.mrb[32].mxu1 %vm916_vm1, %v1599_v62 }
 0xde7   : > { %v1653_v2 = vpop.f32.mrb[32].mxu1 }
 0xde8   : > { %v1660_v7 = vadd.f32 %v1653_v2, %v1472_v49  ;;  %v2095_v8 = vpop.f32.mrb[33].mxu1 }
 0xde9   : > { %v1656_v5 = vpop.f32.mrb[34].mxu1 }
 0xdea   : > { %v1669_v9 = vadd.f32 %v1893_v3, %v1660_v7  ;;  %v1661_v10 = vadd.f32 %v1656_v5, %v1473_v52  ;;  %v2096_v11 = vpop.f32.mrb[35].mxu1 }
 0xdec   : > { %v1671_v12 = vadd.f32 %v1669_v9, %v2907_v0  ;;  %v1670_v13 = vadd.f32 %v1893_v3, %v1661_v10 }
 0xdee   : > { %1673 = vst [vmem:[%s529_s14] sm:$0xff] %v1671_v12  ;;  %v1672_v14 = vadd.f32 %v1670_v13, %v2909_v1 }
 0xdf0   : > { %1674 = vst [vmem:[%s529_s14 + $0x8] sm:$0xff] %v1672_v14 }
 0xdf1   : > { %2453 = shalt.err (!%p2450_p8)
}
 0xdf2   : > { %s2454_s19 = scalar_lea.hbm %s3092_s15, 256  ;;  %s2458_s7 = scalar_lea.hbm %s3187_s0, 512 }
 0xdf3   : > { %p2455_p11 = scmp.ne.s32.totalorder %s3092_s15, %s2454_s19  ;;  %p2459_p1 = scmp.lt.u32.totalorder %s3092_s15, %s3187_s0 }
 0xdf4   : > { %p2460_p2 = scmp.lt.u32.totalorder %s2458_s7, %s2454_s19  ;;  %p2462_p0 = scmp.lt.u32.totalorder %s2454_s19, %s3092_s15 }
 0xdf5   : > { %p2456_p7 = pnand %p2455_p11, %p2778_p10 }
 0xdf6   : > { %p2461_p13 = por %p2460_p2, %p2459_p1 }
 0xdf7   : > { %p2457_p12 = pneg %p2456_p7 }
 0xdf8   : > { %p2463_p4 = por %p2462_p0, %p2461_p13 }
 0xdfa   : > { %p2464_p6 = pnand %p2463_p4, %p2457_p12 }
 0xdfc   : > { %2467 = shalt.err (!%p2464_p6)
}
 0xdfd   : > { %s2540_s14 = smov 128   ;;  %s2541_s13 = smov 8  }
 0xdfe   : > { %2117 = dma.vmem_to_hbm [thread:$0]  (%p2778_p10), %s3087_s11, 256, %s3092_s15, %s1676_s17, %s2540_s14, %s2540_s14, %s2541_s13  }
 0xdff PF: > { %s3188_s16 = sld [smem:[#allocation20_spill]]  ;;  %s3189_s28 = sld [smem:[#allocation21_spill]] }
 0xe00   : > { %p3191_p5 = scmp.ge.s32.totalorder %s2522_s24, 2 }
 0xe05   : > { %s1704_s30 = sand.u32 1, %s3188_s16   ;;  %p3190_p3 = scmp.ne.s32.totalorder %s3189_s28, 0 }
 0xe06   : > { %s1705_s25 = scalar_lea.sflag [#allocation4], %s1704_s30 }
 0xe07   : > { %p2140_p9 = pnand %p3191_p5, %p3190_p3 }
 0xe09   : > { %2505 = dma.done.wait (!%p2140_p9), %s1705_s25, 256  }
 0xe0a   : > { %2507 = vsyncadd (!%p2140_p9), %s1705_s25, 4294967040  ;;  %s3192_s9 = smov %s2768_s21  ;;  %p30_p8 = scmp.ge.s32.totalorder %s2768_s21, 4  }
 0xe0b   : > { %s3193_s21 = smov %s2514_s22  ;;  %s3194_s22 = smov %s2518_s23 }
 0xe0c   : > { %s3195_s23 = smov %s2784_s26  ;;  %s3196_s24 = smov %s3192_s9 }
 0xe0d   :  { %32 = sbr.rel (!%p30_p8) target bundleno = 17 (0x11), region = 142 }
 0xe14   :  { %1710 = vsyncpa [#allocation3], 1 }
 0xe15   :  { %1712 = vsyncpa [#allocation3 + $0x1], 1 }
 0xe16   :  { %1713 = vsyncpa [#allocation6], 1 }
 0xe17   :  { %1715 = vsyncpa [#allocation6 + $0x1], 1 }
 0xe18   :  { %1716 = vsyncpa [#allocation9], 1 }
 0xe19   :  { %1717 = vsyncpa [#allocation12], 1 }
 0xe1a   :  { %1718 = vsyncpa [#allocation4], 1 }
 0xe1b   :  { %1720 = vsyncpa [#allocation4 + $0x1], 1 }

</bundles_post_ra>
